<compile_context>
chip_gen: v6e
topology: v6e:2x2x1
jax: 0.10.0
libtpu: 0.0.40
codegen_flags: <defaults>
</compile_context>

<pallas_src>
import functools
import math

import jax
import jax.numpy as jnp
from jax import lax
from jax.experimental import pallas as pl
from jax.experimental.pallas import tpu as pltpu


def _make_encoder_gru_kernel(n_layers, hidden_size):
    H = hidden_size

    def kernel(tok_ref,      # SMEM scalar prefetch: (1,) int32 (only used by index_map)
               emb_row_ref,  # (1, 1, H) f32 — gathered embedding row
               wrz_ref,      # (2H, 2H) bf16: [[W_ir W_iz],[W_hr W_hz]] (transposed torch layout)
               win_ref,      # (H, H)  bf16: W_in
               whn_ref,      # (H, H)  bf16: W_hn
               brz_ref,      # (1, 2H) f32:  [b_ir+b_hr | b_iz+b_hz]
               bin_ref,      # (1, H)  f32:  b_in
               bhn_ref,      # (1, H)  f32:  b_hn
               h0_ref,       # (1, H)  f32 initial hidden state
               out_ref):     # (1, H)  f32 final hidden state
        del tok_ref  # embedding gather already happened via the index_map

        wdt = wrz_ref.dtype
        wrz = wrz_ref[...]
        win = win_ref[...]
        whn = whn_ref[...]
        brz = brz_ref[...]
        b_in = bin_ref[...]
        b_hn = bhn_ref[...]

        x0 = emb_row_ref[0]          # (1, H) f32 embedded token
        h0 = h0_ref[...]             # (1, H) f32

        def combine(rz, gi_n, gh_n, h):
            # Gate order (r, z, n) matches torch.nn.GRU; slices are 128-lane aligned.
            r = jax.nn.sigmoid(rz[:, :H])
            z = jax.nn.sigmoid(rz[:, H:])
            n = jnp.tanh(gi_n + r * gh_n)
            return n + z * (h - n)   # == (1 - z) * n + z * h

        # ---- layer 0: input (embedded token) generally != hidden ------------
        xh = jnp.concatenate([x0, h0], axis=-1).astype(wdt)                    # (1, 2H)
        rz = jnp.dot(xh, wrz, preferred_element_type=jnp.float32) + brz        # (1, 2H)
        gi_n = jnp.dot(x0.astype(wdt), win,
                       preferred_element_type=jnp.float32) + b_in              # (1, H)
        gh_n = jnp.dot(h0.astype(wdt), whn,
                       preferred_element_type=jnp.float32) + b_hn              # (1, H)
        h = combine(rz, gi_n, gh_n, h0)

        # ---- layers >= 1: input == hidden  -> fold W_i_rz + W_h_rz once -----
        if n_layers > 1:
            wsum_rz = (wrz[:H, :].astype(jnp.float32)
                       + wrz[H:, :].astype(jnp.float32)).astype(wdt)           # (H, 2H)

            def layer_body(_, h):
                hb = h.astype(wdt)
                rz = jnp.dot(hb, wsum_rz, preferred_element_type=jnp.float32) + brz
                gi_n = jnp.dot(hb, win, preferred_element_type=jnp.float32) + b_in
                gh_n = jnp.dot(hb, whn, preferred_element_type=jnp.float32) + b_hn
                return combine(rz, gi_n, gh_n, h)

            h = lax.fori_loop(1, n_layers, layer_body, h, unroll=True)

        out_ref[...] = h.astype(out_ref.dtype)   # single final store

    return kernel


def encoder_rnn_pallas(params, token_id, hidden, n_layers):
    """token_id: scalar int32, hidden: (1,1,H) f32 -> (output, hidden), both (1,1,H)."""
    H = hidden.shape[-1]
    emb = params["embedding"]
    vocab = emb.shape[0]
    # Leading dim is the gathered one; block's trailing (1, H) == array's trailing dims.
    emb3 = emb.reshape(vocab, 1, H)
    # Clamp so an out-of-range token can never gather an arbitrary row.
    tok = jnp.clip(jnp.asarray(token_id, jnp.int32).reshape(1), 0, vocab - 1)
    h0 = hidden.reshape(1, H).astype(jnp.float32)

    kernel = _make_encoder_gru_kernel(n_layers, H)

    h_final = pl.pallas_call(
        kernel,
        out_shape=jax.ShapeDtypeStruct((1, H), jnp.float32),
        grid_spec=pltpu.PrefetchScalarGridSpec(
            num_scalar_prefetch=1,             # token id -> SMEM, fed to index_maps
            grid=(1,),                         # single step; layer loop is in-kernel
            in_specs=[
                # embedding: DMA only the row selected by the prefetched token id
                pl.BlockSpec((1, 1, H), lambda i, tok: (tok[0], 0, 0)),
                pl.BlockSpec((2 * H, 2 * H), lambda i, tok: (0, 0)),   # W_rz (bf16)
                pl.BlockSpec((H, H), lambda i, tok: (0, 0)),           # W_in (bf16)
                pl.BlockSpec((H, H), lambda i, tok: (0, 0)),           # W_hn (bf16)
                pl.BlockSpec((1, 2 * H), lambda i, tok: (0, 0)),       # b_rz
                pl.BlockSpec((1, H), lambda i, tok: (0, 0)),           # b_in
                pl.BlockSpec((1, H), lambda i, tok: (0, 0)),           # b_hn
                pl.BlockSpec((1, H), lambda i, tok: (0, 0)),           # h0
            ],
            out_specs=pl.BlockSpec((1, H), lambda i, tok: (0, 0)),
        ),
        compiler_params=pltpu.CompilerParams(
            dimension_semantics=("arbitrary",)),
    )(tok, emb3, params["w_rz"], params["w_in"], params["w_hn"],
      params["b_rz"], params["b_in"], params["b_hn"], h0)

    out = h_final.reshape(1, 1, H)
    # seq=1: the GRU output equals the new hidden state, exactly as in the PyTorch loop.
    return out, out


@functools.partial(jax.jit, static_argnames=("n_layers",))
def encoder_rnn_forward(params, token_id, hidden, n_layers=1):
    assert n_layers >= 1
    return encoder_rnn_pallas(params, token_id, hidden, n_layers)


def init_params(key, vocab_size, hidden_size, w_dtype=jnp.bfloat16):
    """Shapes/init match nn.Embedding + nn.GRU, packed (no zero block) for the kernel.

    Note: as in the PyTorch tutorial EncoderRNN, all n_layers reuse ONE set of GRU
    weights (self.gru applied repeatedly) — this is NOT nn.GRU(num_layers=n).
    """
    H = hidden_size
    k_emb, k_wih, k_whh, k_bih, k_bhh = jax.random.split(key, 5)
    bound = 1.0 / math.sqrt(H)
    emb = jax.random.normal(k_emb, (vocab_size, H), jnp.float32)              # nn.Embedding
    w_ih = jax.random.uniform(k_wih, (3 * H, H), jnp.float32, -bound, bound)  # torch layout
    w_hh = jax.random.uniform(k_whh, (3 * H, H), jnp.float32, -bound, bound)
    b_ih = jax.random.uniform(k_bih, (3 * H,), jnp.float32, -bound, bound)
    b_hh = jax.random.uniform(k_bhh, (3 * H,), jnp.float32, -bound, bound)

    w_ih_t = w_ih.T.astype(w_dtype)            # (H, 3H), columns ordered (r, z, n)
    w_hh_t = w_hh.T.astype(w_dtype)            # (H, 3H)
    w_rz = jnp.concatenate([w_ih_t[:, :2 * H], w_hh_t[:, :2 * H]], axis=0)  # (2H, 2H)
    w_in = w_ih_t[:, 2 * H:]                   # (H, H)
    w_hn = w_hh_t[:, 2 * H:]                   # (H, H)
    b_rz = (b_ih[:2 * H] + b_hh[:2 * H]).reshape(1, 2 * H).astype(jnp.float32)
    b_in = b_ih[2 * H:].reshape(1, H).astype(jnp.float32)
    b_hn = b_hh[2 * H:].reshape(1, H).astype(jnp.float32)

    return {
        "embedding": emb,
        "w_rz": w_rz, "w_in": w_in, "w_hn": w_hn,
        "b_rz": b_rz, "b_in": b_in, "b_hn": b_hn,
        # original torch-layout params kept only for the pure-JAX reference check
        "_w_ih": w_ih, "_w_hh": w_hh, "_b_ih": b_ih, "_b_hh": b_hh,
    }


def _reference_forward(params, token_id, hidden, n_layers=1):
    """Pure-JAX torch.nn.GRU-style reference with the kernel's bf16 weight/activation
    rounding (but NOT the layer>=1 weight fold).  Against a true f32 torch GRU the
    bf16 weight rounding alone would exceed 1e-4."""
    H = hidden.shape[-1]
    wd = params["w_rz"].dtype
    hi = lax.Precision.HIGHEST
    w_ih_t = params["_w_ih"].T.astype(wd).astype(jnp.float32)
    w_hh_t = params["_w_hh"].T.astype(wd).astype(jnp.float32)
    b_ih = params["_b_ih"].reshape(1, 3 * H)
    b_hh = params["_b_hh"].reshape(1, 3 * H)

    out = params["embedding"][token_id].reshape(1, H)
    h = hidden.reshape(1, H)
    for _ in range(n_layers):
        xb = out.astype(wd).astype(jnp.float32)
        hb = h.astype(wd).astype(jnp.float32)
        gi = jnp.dot(xb, w_ih_t, precision=hi) + b_ih
        gh = jnp.dot(hb, w_hh_t, precision=hi) + b_hh
        r = jax.nn.sigmoid(gi[:, :H] + gh[:, :H])
        z = jax.nn.sigmoid(gi[:, H:2 * H] + gh[:, H:2 * H])
        n = jnp.tanh(gi[:, 2 * H:] + r * gh[:, 2 * H:])
        h = (1.0 - z) * n + z * h
        out = h
    return out.reshape(1, 1, H), h.reshape(1, 1, H)


if __name__ == "__main__":
    VOCAB = 32
    HIDDEN = 256      # module spec (hidden_size = 256); lane-aligned
    N_LAYERS = 2

    key = jax.random.PRNGKey(0)
    params = init_params(key, VOCAB, HIDDEN)

    token_id = jnp.asarray(3, dtype=jnp.int32)           # a single input token
    hidden0 = jnp.zeros((1, 1, HIDDEN), jnp.float32)     # EncoderRNN.init_hidden()

    out, hid = encoder_rnn_forward(params, token_id, hidden0, n_layers=N_LAYERS)
    jax.block_until_ready((out, hid))

    ref_out, ref_hid = _reference_forward(params, token_id, hidden0, n_layers=N_LAYERS)
    assert out.shape == (1, 1, HIDDEN) and hid.shape == (1, 1, HIDDEN)
    # Layers >= 1 use a bf16-rounded folded (W_i_rz + W_h_rz); that extra rounding
    # keeps the deviation from the plain bf16-weight reference well below 2e-3.
    assert jnp.allclose(out, ref_out, atol=2e-3, rtol=2e-3), \
        f"max err {jnp.max(jnp.abs(out - ref_out))}"
    assert jnp.allclose(hid, ref_hid, atol=2e-3, rtol=2e-3), \
        f"max err {jnp.max(jnp.abs(hid - ref_hid))}"

    # Single-layer path (no fold), non-zero hidden state: tight tolerance.
    tok1 = jnp.asarray(7, dtype=jnp.int32)
    h_rand = 0.1 * jax.random.normal(jax.random.PRNGKey(1), (1, 1, HIDDEN), jnp.float32)
    out1, hid1 = encoder_rnn_forward(params, tok1, h_rand, n_layers=1)
    jax.block_until_ready((out1, hid1))
    ref_out1, ref_hid1 = _reference_forward(params, tok1, h_rand, n_layers=1)
    assert jnp.allclose(out1, ref_out1, atol=1e-4, rtol=1e-4), \
        f"max err {jnp.max(jnp.abs(out1 - ref_out1))}"
    assert jnp.allclose(hid1, ref_hid1, atol=1e-4, rtol=1e-4), \
        f"max err {jnp.max(jnp.abs(hid1 - ref_hid1))}"

    print("KERNEL_OK")
</pallas_src>

<mosaic_0001>
module attributes {stable_mosaic.version = 11 : i64} {
  func.func @kernel(%arg0: i32, %arg1: memref<1xi32, #tpu.memory_space<smem>>, %arg2: memref<1x1x256xf32, #tpu.memory_space<vmem>>, %arg3: memref<512x512xbf16, #tpu.memory_space<vmem>>, %arg4: memref<256x256xbf16, #tpu.memory_space<vmem>>, %arg5: memref<256x256xbf16, #tpu.memory_space<vmem>>, %arg6: memref<1x512xf32, #tpu.memory_space<vmem>>, %arg7: memref<1x256xf32, #tpu.memory_space<vmem>>, %arg8: memref<1x256xf32, #tpu.memory_space<vmem>>, %arg9: memref<1x256xf32, #tpu.memory_space<vmem>>, %arg10: memref<1x256xf32, #tpu.memory_space<vmem>>) attributes {dimension_semantics = [#tpu.dimension_semantics<arbitrary>], iteration_bounds = array<i64: 1>, scalar_prefetch = 1 : i64, scratch_operands = 0 : i64, tpu.core_type = #tpu.core_type<tc>, window_params = [{transform_indices = @transform_0, window_bounds = array<i64: 1, 1, 256>}, {pipeline_mode = #tpu.pipeline_mode<synchronous>, transform_indices = @transform_1, window_bounds = array<i64: 512, 512>}, {pipeline_mode = #tpu.pipeline_mode<synchronous>, transform_indices = @transform_2, window_bounds = array<i64: 256, 256>}, {pipeline_mode = #tpu.pipeline_mode<synchronous>, transform_indices = @transform_3, window_bounds = array<i64: 256, 256>}, {pipeline_mode = #tpu.pipeline_mode<synchronous>, transform_indices = @transform_4, window_bounds = array<i64: 1, 512>}, {pipeline_mode = #tpu.pipeline_mode<synchronous>, transform_indices = @transform_5, window_bounds = array<i64: 1, 256>}, {pipeline_mode = #tpu.pipeline_mode<synchronous>, transform_indices = @transform_6, window_bounds = array<i64: 1, 256>}, {pipeline_mode = #tpu.pipeline_mode<synchronous>, transform_indices = @transform_7, window_bounds = array<i64: 1, 256>}, {pipeline_mode = #tpu.pipeline_mode<synchronous>, transform_indices = @transform_8, window_bounds = array<i64: 1, 256>}]} {
    %c0 = arith.constant 0 : index
    %c0_0 = arith.constant 0 : index
    %0 = vector.load %arg3[%c0, %c0_0] : memref<512x512xbf16, #tpu.memory_space<vmem>>, vector<512x512xbf16>
    %c0_1 = arith.constant 0 : index
    %c0_2 = arith.constant 0 : index
    %1 = vector.load %arg4[%c0_1, %c0_2] : memref<256x256xbf16, #tpu.memory_space<vmem>>, vector<256x256xbf16>
    %c0_3 = arith.constant 0 : index
    %c0_4 = arith.constant 0 : index
    %2 = vector.load %arg5[%c0_3, %c0_4] : memref<256x256xbf16, #tpu.memory_space<vmem>>, vector<256x256xbf16>
    %c0_5 = arith.constant 0 : index
    %c0_6 = arith.constant 0 : index
    %3 = vector.load %arg6[%c0_5, %c0_6] : memref<1x512xf32, #tpu.memory_space<vmem>>, vector<1x512xf32>
    %c0_7 = arith.constant 0 : index
    %c0_8 = arith.constant 0 : index
    %4 = vector.load %arg7[%c0_7, %c0_8] : memref<1x256xf32, #tpu.memory_space<vmem>>, vector<1x256xf32>
    %c0_9 = arith.constant 0 : index
    %c0_10 = arith.constant 0 : index
    %5 = vector.load %arg8[%c0_9, %c0_10] : memref<1x256xf32, #tpu.memory_space<vmem>>, vector<1x256xf32>
    %c0_11 = arith.constant 0 : index
    %c0_12 = arith.constant 0 : index
    %c0_13 = arith.constant 0 : index
    %6 = vector.load %arg2[%c0_11, %c0_12, %c0_13] : memref<1x1x256xf32, #tpu.memory_space<vmem>>, vector<1x1x256xf32>
    %7 = vector.shape_cast %6 : vector<1x1x256xf32> to vector<1x256xf32>
    %c0_14 = arith.constant 0 : index
    %c0_15 = arith.constant 0 : index
    %8 = vector.load %arg9[%c0_14, %c0_15] : memref<1x256xf32, #tpu.memory_space<vmem>>, vector<1x256xf32>
    %9 = tpu.concatenate %7, %8 in 1 : vector<1x256xf32>, vector<1x256xf32> -> vector<1x512xf32>
    %10 = arith.truncf %9 : vector<1x512xf32> to vector<1x512xbf16>
    %cst = arith.constant dense<0.000000e+00> : vector<1x512xf32>
    %11 = tpu.matmul %10, %0, %cst {dimension_numbers = #tpu.dot_dimension_numbers<[1], [0], [0], [1], [0, 0, 1, 1], [], []>} : vector<1x512xbf16>, vector<512x512xbf16>, vector<1x512xf32> -> vector<1x512xf32>
    %12 = arith.addf %11, %3 : vector<1x512xf32>
    %13 = arith.truncf %7 : vector<1x256xf32> to vector<1x256xbf16>
    %cst_16 = arith.constant dense<0.000000e+00> : vector<1x256xf32>
    %14 = tpu.matmul %13, %1, %cst_16 {dimension_numbers = #tpu.dot_dimension_numbers<[1], [0], [0], [1], [0, 0, 1, 1], [], []>} : vector<1x256xbf16>, vector<256x256xbf16>, vector<1x256xf32> -> vector<1x256xf32>
    %15 = arith.addf %14, %4 : vector<1x256xf32>
    %16 = arith.truncf %8 : vector<1x256xf32> to vector<1x256xbf16>
    %cst_17 = arith.constant dense<0.000000e+00> : vector<1x256xf32>
    %17 = tpu.matmul %16, %2, %cst_17 {dimension_numbers = #tpu.dot_dimension_numbers<[1], [0], [0], [1], [0, 0, 1, 1], [], []>} : vector<1x256xbf16>, vector<256x256xbf16>, vector<1x256xf32> -> vector<1x256xf32>
    %18 = arith.addf %17, %5 : vector<1x256xf32>
    %19 = vector.extract_strided_slice %12 {offsets = [0, 0], sizes = [1, 256], strides = [1, 1]} : vector<1x512xf32> to vector<1x256xf32>
    %20 = arith.negf %19 : vector<1x256xf32>
    %21 = math.exp %20 : vector<1x256xf32>
    %cst_18 = arith.constant 1.000000e+00 : f32
    %22 = vector.broadcast %cst_18 : f32 to vector<1x256xf32>
    %23 = arith.addf %22, %21 : vector<1x256xf32>
    %24 = arith.divf %22, %23 : vector<1x256xf32>
    %25 = vector.extract_strided_slice %12 {offsets = [0, 256], sizes = [1, 256], strides = [1, 1]} : vector<1x512xf32> to vector<1x256xf32>
    %26 = arith.negf %25 : vector<1x256xf32>
    %27 = math.exp %26 : vector<1x256xf32>
    %cst_19 = arith.constant 1.000000e+00 : f32
    %28 = vector.broadcast %cst_19 : f32 to vector<1x256xf32>
    %29 = arith.addf %28, %27 : vector<1x256xf32>
    %30 = arith.divf %28, %29 : vector<1x256xf32>
    %31 = arith.mulf %24, %18 : vector<1x256xf32>
    %32 = arith.addf %15, %31 : vector<1x256xf32>
    %33 = math.tanh %32 : vector<1x256xf32>
    %34 = arith.subf %8, %33 : vector<1x256xf32>
    %35 = arith.mulf %30, %34 : vector<1x256xf32>
    %36 = arith.addf %33, %35 : vector<1x256xf32>
    %37 = vector.extract_strided_slice %0 {offsets = [0, 0], sizes = [256, 512], strides = [1, 1]} : vector<512x512xbf16> to vector<256x512xbf16>
    %38 = arith.extf %37 : vector<256x512xbf16> to vector<256x512xf32>
    %39 = vector.extract_strided_slice %0 {offsets = [256, 0], sizes = [256, 512], strides = [1, 1]} : vector<512x512xbf16> to vector<256x512xbf16>
    %40 = arith.extf %39 : vector<256x512xbf16> to vector<256x512xf32>
    %41 = arith.addf %38, %40 : vector<256x512xf32>
    %42 = arith.truncf %41 : vector<256x512xf32> to vector<256x512xbf16>
    %c0_i32 = arith.constant 0 : i32
    %43 = arith.truncf %36 : vector<1x256xf32> to vector<1x256xbf16>
    %cst_20 = arith.constant dense<0.000000e+00> : vector<1x512xf32>
    %44 = tpu.matmul %43, %42, %cst_20 {dimension_numbers = #tpu.dot_dimension_numbers<[1], [0], [0], [1], [0, 0, 1, 1], [], []>} : vector<1x256xbf16>, vector<256x512xbf16>, vector<1x512xf32> -> vector<1x512xf32>
    %45 = arith.addf %44, %3 : vector<1x512xf32>
    %cst_21 = arith.constant dense<0.000000e+00> : vector<1x256xf32>
    %46 = tpu.matmul %43, %1, %cst_21 {dimension_numbers = #tpu.dot_dimension_numbers<[1], [0], [0], [1], [0, 0, 1, 1], [], []>} : vector<1x256xbf16>, vector<256x256xbf16>, vector<1x256xf32> -> vector<1x256xf32>
    %47 = arith.addf %46, %4 : vector<1x256xf32>
    %cst_22 = arith.constant dense<0.000000e+00> : vector<1x256xf32>
    %48 = tpu.matmul %43, %2, %cst_22 {dimension_numbers = #tpu.dot_dimension_numbers<[1], [0], [0], [1], [0, 0, 1, 1], [], []>} : vector<1x256xbf16>, vector<256x256xbf16>, vector<1x256xf32> -> vector<1x256xf32>
    %49 = arith.addf %48, %5 : vector<1x256xf32>
    %50 = vector.extract_strided_slice %45 {offsets = [0, 0], sizes = [1, 256], strides = [1, 1]} : vector<1x512xf32> to vector<1x256xf32>
    %51 = arith.negf %50 : vector<1x256xf32>
    %52 = math.exp %51 : vector<1x256xf32>
    %cst_23 = arith.constant 1.000000e+00 : f32
    %53 = vector.broadcast %cst_23 : f32 to vector<1x256xf32>
    %54 = arith.addf %53, %52 : vector<1x256xf32>
    %55 = arith.divf %53, %54 : vector<1x256xf32>
    %56 = vector.extract_strided_slice %45 {offsets = [0, 256], sizes = [1, 256], strides = [1, 1]} : vector<1x512xf32> to vector<1x256xf32>
    %57 = arith.negf %56 : vector<1x256xf32>
    %58 = math.exp %57 : vector<1x256xf32>
    %cst_24 = arith.constant 1.000000e+00 : f32
    %59 = vector.broadcast %cst_24 : f32 to vector<1x256xf32>
    %60 = arith.addf %59, %58 : vector<1x256xf32>
    %61 = arith.divf %59, %60 : vector<1x256xf32>
    %62 = arith.mulf %55, %49 : vector<1x256xf32>
    %63 = arith.addf %47, %62 : vector<1x256xf32>
    %64 = math.tanh %63 : vector<1x256xf32>
    %65 = arith.subf %36, %64 : vector<1x256xf32>
    %66 = arith.mulf %61, %65 : vector<1x256xf32>
    %67 = arith.addf %64, %66 : vector<1x256xf32>
    %c0_25 = arith.constant 0 : index
    %c0_26 = arith.constant 0 : index
    %68 = vector.load %arg10[%c0_25, %c0_26] : memref<1x256xf32, #tpu.memory_space<vmem>>, vector<1x256xf32>
    tpu.vector_store %arg10[%c0_25, %c0_26], %67 {strides = array<i32>} : memref<1x256xf32, #tpu.memory_space<vmem>>, vector<1x256xf32>,
    return
  }
  func.func @transform_0(%arg0: i32, %arg1: memref<1xi32, #tpu.memory_space<smem>>) -> (i32, i32, i32) {
    %c0 = arith.constant 0 : index
    %0 = memref.load %arg1[%c0] : memref<1xi32, #tpu.memory_space<smem>>
    %c0_i32 = arith.constant 0 : i32
    %c0_i32_0 = arith.constant 0 : i32
    %c0_i32_1 = arith.constant 0 : i32
    return %0, %c0_i32, %c0_i32_0 : i32, i32, i32
  }
  func.func @transform_1(%arg0: i32, %arg1: memref<1xi32, #tpu.memory_space<smem>>) -> (i32, i32) {
    %c0_i32 = arith.constant 0 : i32
    %c0_i32_0 = arith.constant 0 : i32
    %c0_i32_1 = arith.constant 0 : i32
    return %c0_i32, %c0_i32_0 : i32, i32
  }
  func.func @transform_2(%arg0: i32, %arg1: memref<1xi32, #tpu.memory_space<smem>>) -> (i32, i32) {
    %c0_i32 = arith.constant 0 : i32
    %c0_i32_0 = arith.constant 0 : i32
    %c0_i32_1 = arith.constant 0 : i32
    return %c0_i32, %c0_i32_0 : i32, i32
  }
  func.func @transform_3(%arg0: i32, %arg1: memref<1xi32, #tpu.memory_space<smem>>) -> (i32, i32) {
    %c0_i32 = arith.constant 0 : i32
    %c0_i32_0 = arith.constant 0 : i32
    %c0_i32_1 = arith.constant 0 : i32
    return %c0_i32, %c0_i32_0 : i32, i32
  }
  func.func @transform_4(%arg0: i32, %arg1: memref<1xi32, #tpu.memory_space<smem>>) -> (i32, i32) {
    %c0_i32 = arith.constant 0 : i32
    %c0_i32_0 = arith.constant 0 : i32
    %c0_i32_1 = arith.constant 0 : i32
    return %c0_i32, %c0_i32_0 : i32, i32
  }
  func.func @transform_5(%arg0: i32, %arg1: memref<1xi32, #tpu.memory_space<smem>>) -> (i32, i32) {
    %c0_i32 = arith.constant 0 : i32
    %c0_i32_0 = arith.constant 0 : i32
    %c0_i32_1 = arith.constant 0 : i32
    return %c0_i32, %c0_i32_0 : i32, i32
  }
  func.func @transform_6(%arg0: i32, %arg1: memref<1xi32, #tpu.memory_space<smem>>) -> (i32, i32) {
    %c0_i32 = arith.constant 0 : i32
    %c0_i32_0 = arith.constant 0 : i32
    %c0_i32_1 = arith.constant 0 : i32
    return %c0_i32, %c0_i32_0 : i32, i32
  }
  func.func @transform_7(%arg0: i32, %arg1: memref<1xi32, #tpu.memory_space<smem>>) -> (i32, i32) {
    %c0_i32 = arith.constant 0 : i32
    %c0_i32_0 = arith.constant 0 : i32
    %c0_i32_1 = arith.constant 0 : i32
    return %c0_i32, %c0_i32_0 : i32, i32
  }
  func.func @transform_8(%arg0: i32, %arg1: memref<1xi32, #tpu.memory_space<smem>>) -> (i32, i32) {
    %c0_i32 = arith.constant 0 : i32
    %c0_i32_0 = arith.constant 0 : i32
    %c0_i32_1 = arith.constant 0 : i32
    return %c0_i32, %c0_i32_0 : i32, i32
  }
}

</mosaic_0001>

<bundles_post_ra>
// kernel: encoder_rnn_forward.1
= control target key start
LH: loop header
LB: loop body
LE: loop exit
PB: predicated region body
PF: predicated region fallthrough
CT: control target
= control target key end

     0   :  { %15 = vsyncpa [#allocation5], 0  ;;  %s3447_s0 = inlined_call_operand.<no memory space> [shape: s32[1], index: 0, kind: input, shape index: {}]   ;;  %s3448_s1 = inlined_call_operand.vmem [shape: f32[32,1,256], index: 1, kind: input, shape index: {}]   ;;  %s3449_s2 = inlined_call_operand.hbm [shape: bf16[512,512], index: 2, kind: input, shape index: {}]   ;;  %s3450_s3 = inlined_call_operand.hbm [shape: bf16[256,256], index: 3, kind: input, shape index: {}]   ;;  %s3451_s4 = inlined_call_operand.hbm [shape: bf16[256,256], index: 4, kind: input, shape index: {}]   ;;  %s3452_s5 = inlined_call_operand.vmem [shape: f32[1,512], index: 5, kind: input, shape index: {}]   ;;  %s3453_s6 = inlined_call_operand.vmem [shape: f32[1,256], index: 6, kind: input, shape index: {}]   ;;  %s3454_s7 = inlined_call_operand.vmem [shape: f32[1,256], index: 7, kind: input, shape index: {}]   ;;  %s3455_s8 = inlined_call_operand.vmem [shape: f32[1,256], index: 8, kind: input, shape index: {}]   ;;  %s3456_s9 = inlined_call_operand.vmem [shape: f32[1,256], index: 9, kind: output, shape index: {}]  }
   0x1   :  { %16 = vsyncpa [#allocation7], 0  ;;  %s3009_s30 = smov [#allocation6]  }
   0x2   :  { %s42_s10 = sshll.u32 %s3009_s30, 4  ;;  %s43_s10 = int_to_ptr.vmem [resolvable:$true] %s42_s10 }
   0x3   :  { %s2953_s11 = scalar_lea.vmem %s43_s10, 4096  ;;  %p2958_p1 = scmp.lt.s32.totalorder %s43_s10, %s43_s10 }
   0x4   :  { %p2954_p0 = scmp.ne.s32.totalorder %s43_s10, %s2953_s11  ;;  %p2959_p2 = scmp.lt.s32.totalorder %s2953_s11, %s2953_s11 }
   0x6   :  { %p2960_p3 = por %p2959_p2, %p2958_p1 }
   0x8   :  { %p2961_p4 = pnand %p2960_p3, %p2954_p0 }
   0xa   :  { %2964 = shalt.err (!%p2961_p4)
}
   0xb   :  { %s3010_s12 = smov 128   ;;  %s3011_s13 = smov 8  }
   0xc   :  { %48 = dma.hbm_to_vmem [thread:$0]  %s3450_s3, 4096, %s43_s10, [#allocation7], %s3010_s12, %s3010_s12, %s3011_s13  }
   0xd   :  { %s3012_s16 = smov [#allocation4]  }
   0xe   :  { %s30_s17 = sshll.u32 %s3012_s16, 4  ;;  %s31_s17 = int_to_ptr.vmem [resolvable:$true] %s30_s17 }
   0xf   :  { %s2973_s18 = scalar_lea.vmem %s31_s17, 16384  ;;  %p2978_p6 = scmp.lt.s32.totalorder %s31_s17, %s31_s17 }
  0x10   :  { %p2974_p5 = scmp.ne.s32.totalorder %s31_s17, %s2973_s18  ;;  %p2979_p7 = scmp.lt.s32.totalorder %s2973_s18, %s2973_s18 }
  0x12   :  { %p2980_p8 = por %p2979_p7, %p2978_p6 }
  0x14   :  { %p2981_p9 = pnand %p2980_p8, %p2974_p5 }
  0x16   :  { %2984 = shalt.err (!%p2981_p9)
}
  0x17   :  { %s3013_s19 = smov 256   ;;  %s3014_s20 = smov 16  }
  0x18   :  { %36 = dma.hbm_to_vmem [thread:$0]  %s3449_s2, 16384, %s31_s17, [#allocation5], %s3013_s19, %s3013_s19, %s3014_s20  }
  0x19   :  { %s3015_s23 = smov [#allocation8]  }
  0x1a   :  { %s54_s24 = sshll.u32 %s3015_s23, 4  ;;  %s55_s24 = int_to_ptr.vmem [resolvable:$true] %s54_s24 }
  0x1b   :  { %s2993_s3 = scalar_lea.vmem %s55_s24, 4096  ;;  %p2998_p11 = scmp.lt.s32.totalorder %s55_s24, %s55_s24 }
  0x1c   :  { %p2994_p10 = scmp.ne.s32.totalorder %s55_s24, %s2993_s3  ;;  %p2999_p12 = scmp.lt.s32.totalorder %s2993_s3, %s2993_s3 }
  0x1e   :  { %p3000_p13 = por %p2999_p12, %p2998_p11 }
  0x20   :  { %p3001_p0 = pnand %p3000_p13, %p2994_p10 }
  0x22   :  { %3004 = shalt.err (!%p3001_p0)
}
  0x23   :  { %60 = dma.hbm_to_vmem [thread:$0]  %s3451_s4, 4096, %s55_s24, [#allocation7], %s3010_s12, %s3010_s12, %s3011_s13  }
  0x24   :  { %3005 = dma.done.wait [#allocation5], 16384  }
  0x25   :  { %3006 = vsyncadd [#allocation5], 4294950912 }
  0x26   :  { %3007 = dma.done.wait [#allocation7], 8192  }
  0x27   :  { %3008 = vsyncadd [#allocation7], 4294959104  ;;  %v117_v0 = vld [vmem:[#allocation4 + $0xe0] sm:$0xff]  ;;  %v119_v1 = vld [vmem:[#allocation4 + $0xf0] sm:$0xff]  ;;  %p84_p1 = scmp.lt.s32.totalorder %s3447_s0, 31  ;;  %v3457_v32 = vlaneseq }
  0x28   :  { %v181_v2 = vld [vmem:[#allocation4 + $0x2e0] sm:$0xff]  ;;  %v2340_v3 = vcombine.high %v117_v0, %v119_v1  ;;  %v183_v4 = vld [vmem:[#allocation4 + $0x2f0] sm:$0xff]  ;;  %v2339_v8 = vcombine.low %v117_v0, %v119_v1 }
  0x29   :  { %v113_v5 = vld [vmem:[#allocation4 + $0xc0] sm:$0xff]  ;;  %v115_v6 = vld [vmem:[#allocation4 + $0xd0] sm:$0xff]  ;;  %v2404_v7 = vcombine.high %v181_v2, %v183_v4  ;;  %v2403_v9 = vcombine.low %v181_v2, %v183_v4  ;;  %s3478_s0 = smov (!%p84_p1, %s3447_s0), 31  ;;  %v3087_v41 = vshrl.u32 %v3457_v32, 7  ;;  %v204_v32 = vld [vmem:[#allocation4 + $0x398] sm:$0xff] }
  0x2a   :  { %v177_v10 = vld [vmem:[#allocation4 + $0x2c0] sm:$0xff]  ;;  %v179_v11 = vld [vmem:[#allocation4 + $0x2d0] sm:$0xff]  ;;  %973 = vmatprep.subr.bf16.mxu0 %v2340_v3  ;;  %v2336_v13 = vcombine.high %v113_v5, %v115_v6  ;;  %v2335_v18 = vcombine.low %v113_v5, %v115_v6  ;;  %s2310_s10 = sshll.u32 %s3478_s0, 1 }
  0x2b   :  { %v109_v12 = vld [vmem:[#allocation4 + $0xa0] sm:$0xff]  ;;  %v2400_v14 = vcombine.high %v177_v10, %v179_v11  ;;  %v111_v15 = vld [vmem:[#allocation4 + $0xb0] sm:$0xff]  ;;  %1014 = vmatprep.subr.bf16.mxu1 %v2404_v7  ;;  %974 = vmatpush1.bf16.msra.mxu0 %v2339_v8  ;;  %v2399_v19 = vcombine.low %v177_v10, %v179_v11  ;;  %3466 = vst [vmem:[#allocation11_spill] sm:$0xff] %v3087_v41  ;;  %s87_s13 = scalar_lea.vmem %s3448_s1, %s2310_s10  ;;  %v3093_v50 = vsub.s32 1, %v3087_v41 }
  0x2c   :  { %v173_v16 = vld [vmem:[#allocation4 + $0x2a0] sm:$0xff]  ;;  %v175_v17 = vld [vmem:[#allocation4 + $0x2b0] sm:$0xff]  ;;  %1015 = vmatpush1.bf16.msra.mxu1 %v2403_v9  ;;  %975 = vmatprep.subr.bf16.mxu0 %v2336_v13  ;;  %v2332_v20 = vcombine.high %v109_v12, %v111_v15  ;;  %v2331_v26 = vcombine.low %v109_v12, %v111_v15 }
  0x2d   :  { %1016 = vmatprep.subr.bf16.mxu1 %v2400_v14  ;;  %v2396_v21 = vcombine.high %v173_v16, %v175_v17  ;;  %v105_v22 = vld [vmem:[#allocation4 + $0x80] sm:$0xff]  ;;  %v107_v23 = vld [vmem:[#allocation4 + $0x90] sm:$0xff]  ;;  %v2395_v27 = vcombine.low %v173_v16, %v175_v17  ;;  %3467 = vst [vmem:[#allocation12_spill] sm:$0xff] %v3093_v50 }
  0x2e   :  { %v169_v24 = vld [vmem:[#allocation4 + $0x280] sm:$0xff]  ;;  %v171_v25 = vld [vmem:[#allocation4 + $0x290] sm:$0xff]  ;;  %v2328_v28 = vcombine.high %v105_v22, %v107_v23  ;;  %v2327_v35 = vcombine.low %v105_v22, %v107_v23 }
  0x2f   :  { %976 = vmatpush1.bf16.msra.mxu0 %v2335_v18  ;;  %v2392_v29 = vcombine.high %v169_v24, %v171_v25  ;;  %v101_v30 = vld [vmem:[#allocation4 + $0x60] sm:$0xff]  ;;  %v103_v31 = vld [vmem:[#allocation4 + $0x70] sm:$0xff]  ;;  %v2391_v36 = vcombine.low %v169_v24, %v171_v25 }
  0x30   :  { %1017 = vmatpush1.bf16.msra.mxu1 %v2399_v19  ;;  %977 = vmatprep.subr.bf16.mxu0 %v2332_v20  ;;  %v165_v33 = vld [vmem:[#allocation4 + $0x260] sm:$0xff]  ;;  %v167_v34 = vld [vmem:[#allocation4 + $0x270] sm:$0xff]  ;;  %v2324_v37 = vcombine.high %v101_v30, %v103_v31  ;;  %v2323_v44 = vcombine.low %v101_v30, %v103_v31 }
  0x31   :  { %1018 = vmatprep.subr.bf16.mxu1 %v2396_v21  ;;  %v2388_v38 = vcombine.high %v165_v33, %v167_v34  ;;  %v97_v39 = vld [vmem:[#allocation4 + $0x40] sm:$0xff]  ;;  %v99_v40 = vld [vmem:[#allocation4 + $0x50] sm:$0xff]  ;;  %v2387_v45 = vcombine.low %v165_v33, %v167_v34 }
  0x32   :  { %v161_v42 = vld [vmem:[#allocation4 + $0x240] sm:$0xff]  ;;  %v163_v43 = vld [vmem:[#allocation4 + $0x250] sm:$0xff]  ;;  %v2320_v46 = vcombine.high %v97_v39, %v99_v40  ;;  %v2319_v53 = vcombine.low %v97_v39, %v99_v40 }
  0x33   :  { %978 = vmatpush1.bf16.msra.mxu0 %v2331_v26  ;;  %v2384_v47 = vcombine.high %v161_v42, %v163_v43  ;;  %v93_v48 = vld [vmem:[#allocation4 + $0x20] sm:$0xff]  ;;  %v95_v49 = vld [vmem:[#allocation4 + $0x30] sm:$0xff]  ;;  %v2383_v54 = vcombine.low %v161_v42, %v163_v43 }
  0x34   :  { %1019 = vmatpush1.bf16.msra.mxu1 %v2395_v27  ;;  %979 = vmatprep.subr.bf16.mxu0 %v2328_v28  ;;  %v157_v51 = vld [vmem:[#allocation4 + $0x220] sm:$0xff]  ;;  %v159_v52 = vld [vmem:[#allocation4 + $0x230] sm:$0xff]  ;;  %v2316_v55 = vcombine.high %v93_v48, %v95_v49  ;;  %v2315_v1 = vcombine.low %v93_v48, %v95_v49 }
  0x35   :  { %1020 = vmatprep.subr.bf16.mxu1 %v2392_v29  ;;  %v3095_v56 = vld [vmem:[%s87_s13] sm:$0x3]  ;;  %v2380_v58 = vcombine.high %v157_v51, %v159_v52  ;;  %v91_v60 = vld [vmem:[#allocation4 + $0x10] sm:$0xff]  ;;  %v2379_v4 = vcombine.low %v157_v51, %v159_v52 }
  0x36   :  { %v3100_v57 = vld [vmem:[%s3455_s8] sm:$0x3]  ;;  %v294_v61 = vrot.slane %v3095_v56, %v3093_v50  ;;  %v155_v0 = vld [vmem:[#allocation4 + $0x210] sm:$0xff] }
  0x37   :  { %980 = vmatpush1.bf16.msra.mxu0 %v2327_v35  ;;  %v89_v59 = vld [vmem:[#allocation4] sm:$0xff]  ;;  %v305_v62 = vrot.slane %v3100_v57, %v3093_v50  ;;  %v151_v8 = vld [vmem:[#allocation4 + $0x1f0] sm:$0xff] }
  0x38   :  { %1021 = vmatpush1.bf16.msra.mxu1 %v2391_v36  ;;  %981 = vmatprep.subr.bf16.mxu0 %v2324_v37  ;;  %v153_v63 = vld [vmem:[#allocation4 + $0x200] sm:$0xff]  ;;  %v3106_v2 = vpack.c.bf16 %v294_v61, %v294_v61  ;;  %v2312_v5 = vcombine.high %v89_v59, %v91_v60  ;;  %v215_v10 = vld [vmem:[#allocation4 + $0x3f0] sm:$0xff]  ;;  %v2311_v11 = vcombine.low %v89_v59, %v91_v60 }
  0x39   :  { %1022 = vmatprep.subr.bf16.mxu1 %v2388_v38  ;;  %v3108_v3 = vpack.c.bf16 %v305_v62, %v305_v62  ;;  %v2376_v6 = vcombine.high %v153_v63, %v155_v0  ;;  %v149_v7 = vld [vmem:[#allocation4 + $0x1e0] sm:$0xff]  ;;  %v2375_v12 = vcombine.low %v153_v63, %v155_v0  ;;  %v147_v16 = vld [vmem:[#allocation4 + $0x1d0] sm:$0xff] }
  0x3a   :  { %1005 = vmatprep.mubr.bf16.mxu0 %v3106_v2  ;;  %v213_v9 = vld [vmem:[#allocation4 + $0x3e0] sm:$0xff]  ;;  %v2372_v13 = vcombine.high %v149_v7, %v151_v8  ;;  %v211_v18 = vld [vmem:[#allocation4 + $0x3d0] sm:$0xff]  ;;  %v2371_v19 = vcombine.low %v149_v7, %v151_v8 }
  0x3b   :  { %982 = vmatpush1.bf16.msra.mxu0 %v2323_v44  ;;  %1046 = vmatprep.mubr.bf16.mxu1 %v3108_v3  ;;  %v2436_v14 = vcombine.high %v213_v9, %v215_v10  ;;  %v145_v15 = vld [vmem:[#allocation4 + $0x1c0] sm:$0xff]  ;;  %v2435_v20 = vcombine.low %v213_v9, %v215_v10  ;;  %v143_v24 = vld [vmem:[#allocation4 + $0x1b0] sm:$0xff]  ;;  %v3113_v10 = vsub.s32 0, %v3087_v41 }
  0x3c   :  { %1023 = vmatpush1.bf16.msra.mxu1 %v2387_v45  ;;  %983 = vmatprep.subr.bf16.mxu0 %v2320_v46  ;;  %v209_v17 = vld [vmem:[#allocation4 + $0x3c0] sm:$0xff]  ;;  %v2368_v21 = vcombine.high %v145_v15, %v147_v16  ;;  %v207_v26 = vld [vmem:[#allocation4 + $0x3b0] sm:$0xff]  ;;  %v2367_v27 = vcombine.low %v145_v15, %v147_v16  ;;  %v3117_v15 = vld [vmem:[#allocation4 + $0xf8] sm:$0xff] }
  0x3d   :  { %1024 = vmatprep.subr.bf16.mxu1 %v2384_v47  ;;  %v2432_v22 = vcombine.high %v209_v17, %v211_v18  ;;  %v141_v23 = vld [vmem:[#allocation4 + $0x1a0] sm:$0xff]  ;;  %v2431_v28 = vcombine.low %v209_v17, %v211_v18  ;;  %v139_v33 = vld [vmem:[#allocation4 + $0x190] sm:$0xff]  ;;  %3468 = vst [vmem:[#allocation13_spill] sm:$0xff] %v3113_v10  ;;  %v3119_v17 = vld [vmem:[#allocation4 + $0x2e8] sm:$0xff]  ;;  %v290_v18 = vrot.slane %v3095_v56, %v3113_v10 }
  0x3e   :  { %v205_v25 = vld [vmem:[#allocation4 + $0x3a0] sm:$0xff]  ;;  %v2364_v29 = vcombine.high %v141_v23, %v143_v24  ;;  %v203_v35 = vld [vmem:[#allocation4 + $0x390] sm:$0xff]  ;;  %v2363_v36 = vcombine.low %v141_v23, %v143_v24  ;;  %v3129_v24 = vld [vmem:[#allocation4 + $0xc8] sm:$0xff] }
  0x3f   :  { %984 = vmatpush1.bf16.msra.mxu0 %v2319_v53  ;;  %v2428_v30 = vcombine.high %v205_v25, %v207_v26  ;;  %v137_v31 = vld [vmem:[#allocation4 + $0x180] sm:$0xff]  ;;  %v2427_v37 = vcombine.low %v205_v25, %v207_v26  ;;  %v135_v42 = vld [vmem:[#allocation4 + $0x170] sm:$0xff]  ;;  %v3131_v25 = vld [vmem:[#allocation4 + $0xd8] sm:$0xff] }
  0x40   :  { %1025 = vmatpush1.bf16.msra.mxu1 %v2383_v54  ;;  %985 = vmatprep.subr.bf16.mxu0 %v2316_v55  ;;  %v201_v34 = vld [vmem:[#allocation4 + $0x380] sm:$0xff]  ;;  %v2360_v38 = vcombine.high %v137_v31, %v139_v33  ;;  %v199_v44 = vld [vmem:[#allocation4 + $0x370] sm:$0xff]  ;;  %v2359_v45 = vcombine.low %v137_v31, %v139_v33  ;;  %v3135_v26 = vld [vmem:[#allocation4 + $0x2c8] sm:$0xff]  ;;  %v2338_v31 = vcombine.high %v3129_v24, %v3131_v25 }
  0x41   :  { %1026 = vmatprep.subr.bf16.mxu1 %v2380_v58  ;;  %v2424_v39 = vcombine.high %v201_v34, %v203_v35  ;;  %v133_v40 = vld [vmem:[#allocation4 + $0x160] sm:$0xff]  ;;  %v2423_v46 = vcombine.low %v201_v34, %v203_v35  ;;  %v131_v49 = vld [vmem:[#allocation4 + $0x150] sm:$0xff]  ;;  %v3149_v33 = vld [vmem:[#allocation4 + $0xa8] sm:$0xff] }
  0x42   :  { %v197_v43 = vld [vmem:[#allocation4 + $0x360] sm:$0xff]  ;;  %v2356_v47 = vcombine.high %v133_v40, %v135_v42  ;;  %v195_v53 = vld [vmem:[#allocation4 + $0x350] sm:$0xff]  ;;  %v2355_v54 = vcombine.low %v133_v40, %v135_v42  ;;  %v3151_v34 = vld [vmem:[#allocation4 + $0xb8] sm:$0xff] }
  0x43   :  { %986 = vmatpush1.bf16.msra.mxu0 %v2315_v1  ;;  %v129_v48 = vld [vmem:[#allocation4 + $0x140] sm:$0xff]  ;;  %v2420_v51 = vcombine.high %v197_v43, %v199_v44  ;;  %v2419_v55 = vcombine.low %v197_v43, %v199_v44  ;;  %v127_v60 = vld [vmem:[#allocation4 + $0x130] sm:$0xff]  ;;  %v2334_v40 = vcombine.high %v3149_v33, %v3151_v34  ;;  %v3167_v42 = vld [vmem:[#allocation4 + $0x88] sm:$0xff] }
  0x44   :  { %1027 = vmatpush1.bf16.msra.mxu1 %v2379_v4  ;;  %987 = vmatprep.subr.bf16.mxu0 %v2312_v5  ;;  %v193_v52 = vld [vmem:[#allocation4 + $0x340] sm:$0xff]  ;;  %v2352_v58 = vcombine.high %v129_v48, %v131_v49  ;;  %v191_v63 = vld [vmem:[#allocation4 + $0x330] sm:$0xff]  ;;  %v2351_v0 = vcombine.low %v129_v48, %v131_v49  ;;  %v3169_v43 = vld [vmem:[#allocation4 + $0x98] sm:$0xff] }
  0x45   :  { %1028 = vmatprep.subr.bf16.mxu1 %v2376_v6  ;;  %v125_v59 = vld [vmem:[#allocation4 + $0x120] sm:$0xff]  ;;  %v2416_v61 = vcombine.high %v193_v52, %v195_v53  ;;  %v2415_v1 = vcombine.low %v193_v52, %v195_v53  ;;  %v123_v6 = vld [vmem:[#allocation4 + $0x110] sm:$0xff]  ;;  %v2330_v49 = vcombine.high %v3167_v42, %v3169_v43  ;;  %v3187_v52 = vld [vmem:[#allocation4 + $0x78] sm:$0xff] }
  0x46   :  { %v189_v62 = vld [vmem:[#allocation4 + $0x320] sm:$0xff]  ;;  %v2348_v4 = vcombine.high %v125_v59, %v127_v60  ;;  %v187_v9 = vld [vmem:[#allocation4 + $0x310] sm:$0xff] }
  0x47   :  { %988 = vmatpush1.bf16.msra.mxu0 %v2311_v11  ;;  %v121_v5 = vld [vmem:[#allocation4 + $0x100] sm:$0xff]  ;;  %v2412_v7 = vcombine.high %v189_v62, %v191_v63  ;;  %v2347_v11 = vcombine.low %v125_v59, %v127_v60 }
  0x48   :  { %1029 = vmatpush1.bf16.msra.mxu1 %v2375_v12  ;;  %989 = vmatprep.subr.bf16.mxu0 %v2372_v13  ;;  %v185_v8 = vld [vmem:[#allocation4 + $0x300] sm:$0xff]  ;;  %v2411_v12 = vcombine.low %v189_v62, %v191_v63  ;;  %v2344_v13 = vcombine.high %v121_v5, %v123_v6  ;;  %v3203_v62 = vld [vmem:[#allocation4 + $0x58] sm:$0xff] }
  0x49   :  { %1030 = vmatprep.subr.bf16.mxu1 %v2436_v14  ;;  %v3115_v14 = vld [vmem:[#allocation4 + $0xe8] sm:$0xff]  ;;  %v2408_v16 = vcombine.high %v185_v8, %v187_v9 }
  0x4a   :  { %v2342_v23 = vcombine.high %v3115_v14, %v3117_v15 }
  0x4b   :  { %990 = vmatpush2.bf16.msra.mxu0 %v2371_v19  ;;  %v3123_v19 = vld [vmem:[#allocation4 + $0x2f8] sm:$0xff] }
  0x4c   :  { %1031 = vmatpush2.bf16.msra.mxu1 %v2435_v20  ;;  %991 = vmatprep.subr.bf16.mxu0 %v2368_v21  ;;  %v2343_v20 = vcombine.low %v121_v5, %v123_v6  ;;  %v301_v21 = vrot.slane %v3100_v57, %v3113_v10  ;;  %v2406_v56 = vcombine.high %v3119_v17, %v3123_v19 }
  0x4d   :  { %1032 = vmatprep.subr.bf16.mxu1 %v2432_v22  ;;  %v2407_v22 = vcombine.low %v185_v8, %v187_v9  ;;  %v3219_v8 = vld [vmem:[#allocation4 + $0x38] sm:$0xff] }
  0x4e   :  { %v3141_v57 = vpack.c.bf16 %v301_v21, %v301_v21  ;;  %v3235_v21 = vld [vmem:[#allocation4 + $0x8] sm:$0xff] }
  0x4f   :  { %992 = vmatpush2.bf16.msra.mxu0 %v2367_v27  ;;  %v3137_v27 = vpack.c.bf16 %v290_v18, %v290_v18 }
  0x50   :  { %1033 = vmatpush2.bf16.msra.mxu1 %v2431_v28  ;;  %993 = vmatprep.subr.bf16.mxu0 %v2364_v29  ;;  %v3139_v28 = vld [vmem:[#allocation4 + $0x2d8] sm:$0xff]  ;;  %v2341_v29 = vcombine.low %v3115_v14, %v3117_v15 }
  0x51   :  { %1034 = vmatprep.subr.bf16.mxu1 %v2428_v30  ;;  %v2405_v30 = vcombine.low %v3119_v17, %v3123_v19  ;;  %v2402_v35 = vcombine.high %v3135_v26, %v3139_v28 }
  0x53   :  { %994 = vmatpush2.bf16.msra.mxu0 %v2363_v36  ;;  %v3155_v36 = vld [vmem:[#allocation4 + $0x2a8] sm:$0xff] }
  0x54   :  { %1035 = vmatpush2.bf16.msra.mxu1 %v2427_v37  ;;  %995 = vmatprep.subr.bf16.mxu0 %v2360_v38  ;;  %v3158_v37 = vld [vmem:[#allocation4 + $0x2b8] sm:$0xff]  ;;  %v2337_v38 = vcombine.low %v3129_v24, %v3131_v25 }
  0x55   :  { %1036 = vmatprep.subr.bf16.mxu1 %v2424_v39  ;;  %v2401_v39 = vcombine.low %v3135_v26, %v3139_v28  ;;  %v2398_v44 = vcombine.high %v3155_v36, %v3158_v37  ;;  %v2397_v48 = vcombine.low %v3155_v36, %v3158_v37 }
  0x57   :  { %996 = vmatpush2.bf16.msra.mxu0 %v2359_v45  ;;  %v3173_v45 = vld [vmem:[#allocation4 + $0x288] sm:$0xff] }
  0x58   :  { %1037 = vmatpush2.bf16.msra.mxu1 %v2423_v46  ;;  %997 = vmatprep.subr.bf16.mxu0 %v2356_v47  ;;  %v3176_v46 = vld [vmem:[#allocation4 + $0x298] sm:$0xff]  ;;  %v2333_v47 = vcombine.low %v3149_v33, %v3151_v34 }
  0x59   :  { %1038 = vmatprep.subr.bf16.mxu1 %v2420_v51  ;;  %v3185_v51 = vld [vmem:[#allocation4 + $0x68] sm:$0xff]  ;;  %v2394_v53 = vcombine.high %v3173_v45, %v3176_v46  ;;  %v2393_v59 = vcombine.low %v3173_v45, %v3176_v46 }
  0x5a   :  { %v2326_v60 = vcombine.high %v3185_v51, %v3187_v52 }
  0x5b   :  { %998 = vmatpush2.bf16.msra.mxu0 %v2355_v54  ;;  %v3191_v54 = vld [vmem:[#allocation4 + $0x268] sm:$0xff] }
  0x5c   :  { %1039 = vmatpush2.bf16.msra.mxu1 %v2419_v55  ;;  %999 = vmatprep.subr.bf16.mxu0 %v2352_v58  ;;  %v3193_v55 = vld [vmem:[#allocation4 + $0x278] sm:$0xff]  ;;  %v2329_v58 = vcombine.low %v3167_v42, %v3169_v43 }
  0x5d   :  { %1040 = vmatprep.subr.bf16.mxu1 %v2416_v61  ;;  %v3201_v61 = vld [vmem:[#allocation4 + $0x48] sm:$0xff]  ;;  %v2390_v63 = vcombine.high %v3191_v54, %v3193_v55  ;;  %v2389_v5 = vcombine.low %v3191_v54, %v3193_v55 }
  0x5e   :  { %v2322_v6 = vcombine.high %v3201_v61, %v3203_v62 }
  0x5f   :  { %1000 = vmatpush2.bf16.msra.mxu0 %v2351_v0  ;;  %v3207_v0 = vld [vmem:[#allocation4 + $0x248] sm:$0xff] }
  0x60   :  { %1041 = vmatpush2.bf16.msra.mxu1 %v2415_v1  ;;  %1001 = vmatprep.subr.bf16.mxu0 %v2348_v4  ;;  %v3209_v1 = vld [vmem:[#allocation4 + $0x258] sm:$0xff]  ;;  %v2325_v4 = vcombine.low %v3185_v51, %v3187_v52 }
  0x61   :  { %1042 = vmatprep.subr.bf16.mxu1 %v2412_v7  ;;  %v3217_v7 = vld [vmem:[#allocation4 + $0x28] sm:$0xff]  ;;  %v2386_v9 = vcombine.high %v3207_v0, %v3209_v1 }
  0x62   :  { %v2318_v18 = vcombine.high %v3217_v7, %v3219_v8 }
  0x63   :  { %1002 = vmatpush2.bf16.msra.mxu0 %v2347_v11  ;;  %v3223_v11 = vld [vmem:[#allocation4 + $0x228] sm:$0xff] }
  0x64   :  { %1043 = vmatpush2.bf16.msra.mxu1 %v2411_v12  ;;  %1003 = vmatprep.subr.bf16.mxu0 %v2344_v13  ;;  %v3225_v12 = vld [vmem:[#allocation4 + $0x238] sm:$0xff]  ;;  %v2321_v13 = vcombine.low %v3201_v61, %v3203_v62 }
  0x65   :  { %1044 = vmatprep.subr.bf16.mxu1 %v2408_v16  ;;  %v2385_v16 = vcombine.low %v3207_v0, %v3209_v1 }
  0x67   :  { %1004 = vmatpush2.bf16.msra.mxu0 %v2343_v20  ;;  %v2382_v20 = vcombine.high %v3223_v11, %v3225_v12 }
  0x68   :  { %1045 = vmatpush2.bf16.msra.mxu1 %v2407_v22  ;;  %1055 = vmatprep.subr.bf16.mxu0 %v2342_v23  ;;  %v3237_v22 = vld [vmem:[#allocation4 + $0x18] sm:$0xff]  ;;  %v3239_v23 = vld [vmem:[#allocation4 + $0x208] sm:$0xff] }
  0x69   :  { %1096 = vmatprep.subr.bf16.mxu1 %v2406_v56  ;;  %v3241_v56 = vld [vmem:[#allocation4 + $0x218] sm:$0xff] }
  0x6a   :  { %1006 = vmatmul.mubr.bf16.vlgmr.msra.gmra.mxu0 %v3137_v27 }
  0x6b   :  { %1047 = vmatmul.mubr.bf16.vlgmr.msra.gmra.mxu1 %v3141_v57  ;;  %1056 = vmatpush1.bf16.msra.mxu0 %v2341_v29  ;;  %v2317_v29 = vcombine.low %v3217_v7, %v3219_v8 }
  0x6c   :  { %1097 = vmatpush1.bf16.msra.mxu1 %v2405_v30  ;;  %1057 = vmatprep.subr.bf16.mxu0 %v2338_v31  ;;  %v2381_v30 = vcombine.low %v3223_v11, %v3225_v12  ;;  %v2314_v31 = vcombine.high %v3235_v21, %v3237_v22 }
  0x6d   :  { %1098 = vmatprep.subr.bf16.mxu1 %v2402_v35  ;;  %1087 = vmatprep.mubr.bf16.mxu0 %v3106_v2  ;;  %v2378_v35 = vcombine.high %v3239_v23, %v3241_v56 }
  0x6e   :  { %1128 = vmatprep.mubr.bf16.mxu1 %v3108_v3 }
  0x6f   :  { %1058 = vmatpush1.bf16.msra.mxu0 %v2337_v38  ;;  %v3251_v38 = vld [vmem:[#allocation4 + $0x1e8] sm:$0xff] }
  0x70   :  { %1099 = vmatpush1.bf16.msra.mxu1 %v2401_v39  ;;  %1059 = vmatprep.subr.bf16.mxu0 %v2334_v40  ;;  %v3253_v39 = vld [vmem:[#allocation4 + $0x1f8] sm:$0xff]  ;;  %v3255_v40 = vld [vmem:[#allocation4 + $0x3e8] sm:$0xff] }
  0x71   :  { %1100 = vmatprep.subr.bf16.mxu1 %v2398_v44  ;;  %3469 = vst [vmem:[#allocation14_spill] sm:$0xff] %v3255_v40  ;;  %v3257_v44 = vld [vmem:[#allocation4 + $0x3f8] sm:$0xff] }
  0x72   :  { %3470 = vst [vmem:[#allocation15_spill] sm:$0xff] %v3257_v44 }
  0x73   :  { %1060 = vmatpush1.bf16.msra.mxu0 %v2333_v47  ;;  %v2313_v47 = vcombine.low %v3235_v21, %v3237_v22 }
  0x74   :  { %1101 = vmatpush1.bf16.msra.mxu1 %v2397_v48  ;;  %1061 = vmatprep.subr.bf16.mxu0 %v2330_v49  ;;  %v2377_v48 = vcombine.low %v3239_v23, %v3241_v56  ;;  %v2374_v49 = vcombine.high %v3251_v38, %v3253_v39 }
  0x75   :  { %1102 = vmatprep.subr.bf16.mxu1 %v2394_v53  ;;  %v2438_v53 = vcombine.high %v3255_v40, %v3257_v44 }
  0x77   :  { %1062 = vmatpush1.bf16.msra.mxu0 %v2329_v58  ;;  %v146_v58 = vld [vmem:[#allocation4 + $0x1c8] sm:$0xff] }
  0x78   :  { %1103 = vmatpush1.bf16.msra.mxu1 %v2393_v59  ;;  %1063 = vmatprep.subr.bf16.mxu0 %v2326_v60  ;;  %v148_v59 = vld [vmem:[#allocation4 + $0x1d8] sm:$0xff]  ;;  %v210_v60 = vld [vmem:[#allocation4 + $0x3c8] sm:$0xff] }
  0x79   :  { %1104 = vmatprep.subr.bf16.mxu1 %v2390_v63  ;;  %v212_v63 = vld [vmem:[#allocation4 + $0x3d8] sm:$0xff] }
  0x7b   :  { %1064 = vmatpush1.bf16.msra.mxu0 %v2325_v4  ;;  %v2373_v4 = vcombine.low %v3251_v38, %v3253_v39 }
  0x7c   :  { %1105 = vmatpush1.bf16.msra.mxu1 %v2389_v5  ;;  %1065 = vmatprep.subr.bf16.mxu0 %v2322_v6  ;;  %v2437_v5 = vcombine.low %v3255_v40, %v3257_v44  ;;  %v2370_v6 = vcombine.high %v146_v58, %v148_v59 }
  0x7d   :  { %1106 = vmatprep.subr.bf16.mxu1 %v2386_v9  ;;  %v2434_v9 = vcombine.high %v210_v60, %v212_v63 }
  0x7f   :  { %1066 = vmatpush1.bf16.msra.mxu0 %v2321_v13  ;;  %v142_v13 = vld [vmem:[#allocation4 + $0x1a8] sm:$0xff] }
  0x80   :  { %1107 = vmatpush1.bf16.msra.mxu1 %v2385_v16  ;;  %1067 = vmatprep.subr.bf16.mxu0 %v2318_v18  ;;  %v144_v16 = vld [vmem:[#allocation4 + $0x1b8] sm:$0xff]  ;;  %v206_v18 = vld [vmem:[#allocation4 + $0x3a8] sm:$0xff] }
  0x81   :  { %1108 = vmatprep.subr.bf16.mxu1 %v2382_v20  ;;  %v208_v20 = vld [vmem:[#allocation4 + $0x3b8] sm:$0xff]  ;;  %v2365_v41 = vcombine.low %v142_v13, %v144_v16 }
  0x83   :  { %1068 = vmatpush1.bf16.msra.mxu0 %v2317_v29  ;;  %v2369_v29 = vcombine.low %v146_v58, %v148_v59  ;;  %v136_v58 = vld [vmem:[#allocation4 + $0x178] sm:$0xff]  ;;  %v198_v59 = vld [vmem:[#allocation4 + $0x368] sm:$0xff] }
  0x84   :  { %1109 = vmatpush1.bf16.msra.mxu1 %v2381_v30  ;;  %1069 = vmatprep.subr.bf16.mxu0 %v2314_v31  ;;  %v2433_v30 = vcombine.low %v210_v60, %v212_v63  ;;  %v2366_v31 = vcombine.high %v142_v13, %v144_v16  ;;  %v132_v13 = vld [vmem:[#allocation4 + $0x158] sm:$0xff]  ;;  %v194_v16 = vld [vmem:[#allocation4 + $0x348] sm:$0xff] }
  0x85   :  { %1110 = vmatprep.subr.bf16.mxu1 %v2378_v35  ;;  %v2430_v35 = vcombine.high %v206_v18, %v208_v20 }
  0x87   :  { %1070 = vmatpush1.bf16.msra.mxu0 %v2313_v47  ;;  %v138_v47 = vld [vmem:[#allocation4 + $0x188] sm:$0xff] }
  0x88   :  { %1111 = vmatpush1.bf16.msra.mxu1 %v2377_v48  ;;  %1071 = vmatprep.subr.bf16.mxu0 %v2374_v49  ;;  %v140_v48 = vld [vmem:[#allocation4 + $0x198] sm:$0xff]  ;;  %v202_v49 = vld [vmem:[#allocation4 + $0x388] sm:$0xff] }
  0x89   :  { %1112 = vmatprep.subr.bf16.mxu1 %v2438_v53  ;;  %v2429_v53 = vcombine.low %v206_v18, %v208_v20  ;;  %v2362_v44 = vcombine.high %v138_v47, %v140_v48  ;;  %v2426_v40 = vcombine.high %v202_v49, %v204_v32  ;;  %v2361_v60 = vcombine.low %v138_v47, %v140_v48  ;;  %v128_v47 = vld [vmem:[#allocation4 + $0x138] sm:$0xff]  ;;  %v190_v48 = vld [vmem:[#allocation4 + $0x328] sm:$0xff] }
  0x8a   :  { %v2425_v63 = vcombine.low %v202_v49, %v204_v32 }
  0x8b   :  { %1072 = vmatpush2.bf16.msra.mxu0 %v2373_v4  ;;  %v134_v4 = vld [vmem:[#allocation4 + $0x168] sm:$0xff] }
  0x8c   :  { %1113 = vmatpush2.bf16.msra.mxu1 %v2437_v5  ;;  %1073 = vmatprep.subr.bf16.mxu0 %v2370_v6  ;;  %v200_v5 = vld [vmem:[#allocation4 + $0x378] sm:$0xff]  ;;  %v2358_v6 = vcombine.high %v134_v4, %v136_v58  ;;  %v2357_v18 = vcombine.low %v134_v4, %v136_v58  ;;  %v186_v58 = vld [vmem:[#allocation4 + $0x308] sm:$0xff] }
  0x8d   :  { %1114 = vmatprep.subr.bf16.mxu1 %v2434_v9  ;;  %v2422_v9 = vcombine.high %v198_v59, %v200_v5  ;;  %v2421_v20 = vcombine.low %v198_v59, %v200_v5  ;;  %v124_v4 = vld [vmem:[#allocation4 + $0x118] sm:$0xff] }
  0x8f   :  { %1074 = vmatpush2.bf16.msra.mxu0 %v2369_v29  ;;  %v130_v29 = vld [vmem:[#allocation4 + $0x148] sm:$0xff] }
  0x90   :  { %1115 = vmatpush2.bf16.msra.mxu1 %v2433_v30  ;;  %1075 = vmatprep.subr.bf16.mxu0 %v2366_v31  ;;  %v196_v30 = vld [vmem:[#allocation4 + $0x358] sm:$0xff]  ;;  %v2354_v31 = vcombine.high %v130_v29, %v132_v13  ;;  %v2353_v32 = vcombine.low %v130_v29, %v132_v13 }
  0x91   :  { %1116 = vmatprep.subr.bf16.mxu1 %v2430_v35  ;;  %v2418_v35 = vcombine.high %v194_v16, %v196_v30 }
  0x93   :  { %1076 = vmatpush2.bf16.msra.mxu0 %v2365_v41  ;;  %v126_v41 = vld [vmem:[#allocation4 + $0x128] sm:$0xff] }
  0x94   :  { %1117 = vmatpush2.bf16.msra.mxu1 %v2429_v53  ;;  %1077 = vmatprep.subr.bf16.mxu0 %v2362_v44  ;;  %v192_v44 = vld [vmem:[#allocation4 + $0x338] sm:$0xff]  ;;  %v2350_v49 = vcombine.high %v126_v41, %v128_v47  ;;  %v2349_v59 = vcombine.low %v126_v41, %v128_v47  ;;  %v2653_v41 = vld [vmem:[#allocation6 + $0x60] ss:$8 sps:$4 sm:$0xff]  }
  0x95   :  { %1118 = vmatprep.subr.bf16.mxu1 %v2426_v40  ;;  %v2417_v40 = vcombine.low %v194_v16, %v196_v30  ;;  %v2414_v53 = vcombine.high %v190_v48, %v192_v44  ;;  %v2413_v5 = vcombine.low %v190_v48, %v192_v44  ;;  %v2649_v16 = vld [vmem:[#allocation6 + $0x74] ss:$8 sps:$4 sm:$0xff]   ;;  %v2656_v47 = vld [vmem:[#allocation8 + $0x60] ss:$8 sps:$4 sm:$0xff]  }
  0x96   :  { %v2652_v30 = vld [vmem:[#allocation8 + $0x74] ss:$8 sps:$4 sm:$0xff]  }
  0x97   :  { %1078 = vmatpush2.bf16.msra.mxu0 %v2361_v60  ;;  %v122_v60 = vld [vmem:[#allocation4 + $0x108] sm:$0xff]  ;;  %v2661_v48 = vld [vmem:[#allocation6 + $0x54] ss:$8 sps:$4 sm:$0xff]  }
  0x98   :  { %1119 = vmatpush2.bf16.msra.mxu1 %v2425_v63  ;;  %1079 = vmatprep.subr.bf16.mxu0 %v2358_v6  ;;  %v188_v63 = vld [vmem:[#allocation4 + $0x318] sm:$0xff]  ;;  %v2346_v6 = vcombine.high %v122_v60, %v124_v4  ;;  %v2345_v29 = vcombine.low %v122_v60, %v124_v4  ;;  %v2665_v60 = vld [vmem:[#allocation6 + $0x40] ss:$8 sps:$4 sm:$0xff]  }
  0x99   :  { %1120 = vmatprep.subr.bf16.mxu1 %v2422_v9  ;;  %v2410_v9 = vcombine.high %v186_v58, %v188_v63  ;;  %v2409_v13 = vcombine.low %v186_v58, %v188_v63  ;;  %v2664_v44 = vld [vmem:[#allocation8 + $0x54] ss:$8 sps:$4 sm:$0xff]   ;;  %v2668_v4 = vld [vmem:[#allocation8 + $0x40] ss:$8 sps:$4 sm:$0xff]  }
  0x9a   :  { %v2673_v58 = vld [vmem:[#allocation6 + $0x34] ss:$8 sps:$4 sm:$0xff]  }
  0x9b   :  { %1080 = vmatpush2.bf16.msra.mxu0 %v2357_v18  ;;  %v2647_v18 = vld [vmem:[#allocation6 + $0x70] ss:$8 sps:$4 sm:$0xff]   ;;  %v2676_v63 = vld [vmem:[#allocation8 + $0x34] ss:$8 sps:$4 sm:$0xff]  }
  0x9c   :  { %1121 = vmatpush2.bf16.msra.mxu1 %v2421_v20  ;;  %1081 = vmatprep.subr.bf16.mxu0 %v2354_v31  ;;  %v2650_v20 = vld [vmem:[#allocation8 + $0x70] ss:$8 sps:$4 sm:$0xff]   ;;  %v2655_v31 = vld [vmem:[#allocation6 + $0x64] ss:$8 sps:$4 sm:$0xff]  }
  0x9d   :  { %1122 = vmatprep.subr.bf16.mxu1 %v2418_v35  ;;  %v2658_v35 = vld [vmem:[#allocation8 + $0x64] ss:$8 sps:$4 sm:$0xff]  }
  0x9f   :  { %1082 = vmatpush2.bf16.msra.mxu0 %v2353_v32  ;;  %v2659_v32 = vld [vmem:[#allocation6 + $0x50] ss:$8 sps:$4 sm:$0xff]  }
  0xa0   :  { %1123 = vmatpush2.bf16.msra.mxu1 %v2417_v40  ;;  %1083 = vmatprep.subr.bf16.mxu0 %v2350_v49  ;;  %v2662_v40 = vld [vmem:[#allocation8 + $0x50] ss:$8 sps:$4 sm:$0xff]   ;;  %v2667_v49 = vld [vmem:[#allocation6 + $0x44] ss:$8 sps:$4 sm:$0xff]  }
  0xa1   :  { %1124 = vmatprep.subr.bf16.mxu1 %v2414_v53  ;;  %v2670_v53 = vld [vmem:[#allocation8 + $0x44] ss:$8 sps:$4 sm:$0xff]  }
  0xa3   :  { %1084 = vmatpush2.bf16.msra.mxu0 %v2349_v59  ;;  %v2679_v59 = vld [vmem:[#allocation6 + $0x24] ss:$8 sps:$4 sm:$0xff]  }
  0xa4   :  { %1125 = vmatpush2.bf16.msra.mxu1 %v2413_v5  ;;  %1085 = vmatprep.subr.bf16.mxu0 %v2346_v6  ;;  %v2682_v5 = vld [vmem:[#allocation8 + $0x24] ss:$8 sps:$4 sm:$0xff]   ;;  %v2677_v6 = vld [vmem:[#allocation6 + $0x20] ss:$8 sps:$4 sm:$0xff]  }
  0xa5   :  { %1126 = vmatprep.subr.bf16.mxu1 %v2410_v9  ;;  %v2680_v9 = vld [vmem:[#allocation8 + $0x20] ss:$8 sps:$4 sm:$0xff]  }
  0xa7   :  { %1086 = vmatpush2.bf16.msra.mxu0 %v2345_v29  ;;  %v2685_v29 = vld [vmem:[#allocation6 + $0x14] ss:$8 sps:$4 sm:$0xff]  }
  0xa8   :  { %1127 = vmatpush2.bf16.msra.mxu1 %v2409_v13  ;;  %1308 = vmatprep.subr.bf16.mxu0 %v2649_v16  ;;  %v2688_v13 = vld [vmem:[#allocation8 + $0x14] ss:$8 sps:$4 sm:$0xff]   ;;  %v2683_v16 = vld [vmem:[#allocation6 + $0x10] ss:$8 sps:$4 sm:$0xff]  }
  0xa9   :  { %1520 = vmatprep.subr.bf16.mxu1 %v2652_v30  ;;  %v2686_v30 = vld [vmem:[#allocation8 + $0x10] ss:$8 sps:$4 sm:$0xff]  }
  0xaa   :  { %1088 = vmatmul.mubr.bf16.vlgmr.msra.gmra.mxu0 %v3137_v27 }
  0xab   :  { %1129 = vmatmul.mubr.bf16.vlgmr.msra.gmra.mxu1 %v3141_v57  ;;  %1309 = vmatpush1.bf16.msra.mxu0 %v2647_v18  ;;  %v2691_v18 = vld [vmem:[#allocation6 + $0x4] ss:$8 sps:$4 sm:$0xff]  }
  0xac   :  { %1521 = vmatpush1.bf16.msra.mxu1 %v2650_v20  ;;  %1310 = vmatprep.subr.bf16.mxu0 %v2655_v31  ;;  %v2694_v20 = vld [vmem:[#allocation8 + $0x4] ss:$8 sps:$4 sm:$0xff]   ;;  %v2689_v31 = vld [vmem:[#allocation6] ss:$8 sps:$4 sm:$0xff]  }
  0xad   :  { %1522 = vmatprep.subr.bf16.mxu1 %v2658_v35  ;;  %1340 = vmatprep.mubr.bf16.mxu0 %v3106_v2  ;;  %v2671_v2 = vld [vmem:[#allocation6 + $0x30] ss:$8 sps:$4 sm:$0xff]   ;;  %v2692_v35 = vld [vmem:[#allocation8] ss:$8 sps:$4 sm:$0xff]  }
  0xae   :  { %1552 = vmatprep.mubr.bf16.mxu1 %v3108_v3  ;;  %v2674_v3 = vld [vmem:[#allocation8 + $0x30] ss:$8 sps:$4 sm:$0xff]  }
  0xaf   :  { %1311 = vmatpush1.bf16.msra.mxu0 %v2653_v41  ;;  %v2697_v41 = vld [vmem:[#allocation6 + $0xf4] ss:$8 sps:$4 sm:$0xff]  }
  0xb0   :  { %1523 = vmatpush1.bf16.msra.mxu1 %v2656_v47  ;;  %1312 = vmatprep.subr.bf16.mxu0 %v2661_v48  ;;  %v2700_v47 = vld [vmem:[#allocation8 + $0xf4] ss:$8 sps:$4 sm:$0xff]   ;;  %v2695_v48 = vld [vmem:[#allocation6 + $0xf0] ss:$8 sps:$4 sm:$0xff]  }
  0xb1   :  { %1524 = vmatprep.subr.bf16.mxu1 %v2664_v44  ;;  %v2698_v44 = vld [vmem:[#allocation8 + $0xf0] ss:$8 sps:$4 sm:$0xff]  }
  0xb3   :  { %1313 = vmatpush1.bf16.msra.mxu0 %v2659_v32  ;;  %v2703_v32 = vld [vmem:[#allocation6 + $0xe4] ss:$8 sps:$4 sm:$0xff]  }
  0xb4   :  { %1525 = vmatpush1.bf16.msra.mxu1 %v2662_v40  ;;  %1314 = vmatprep.subr.bf16.mxu0 %v2667_v49  ;;  %v2706_v40 = vld [vmem:[#allocation8 + $0xe4] ss:$8 sps:$4 sm:$0xff]   ;;  %v2701_v49 = vld [vmem:[#allocation6 + $0xe0] ss:$8 sps:$4 sm:$0xff]  }
  0xb5   :  { %1526 = vmatprep.subr.bf16.mxu1 %v2670_v53  ;;  %v2704_v53 = vld [vmem:[#allocation8 + $0xe0] ss:$8 sps:$4 sm:$0xff]  }
  0xb7   :  { %1315 = vmatpush1.bf16.msra.mxu0 %v2665_v60  ;;  %v2709_v60 = vld [vmem:[#allocation6 + $0xd4] ss:$8 sps:$4 sm:$0xff]  }
  0xb8   :  { %1527 = vmatpush1.bf16.msra.mxu1 %v2668_v4  ;;  %1316 = vmatprep.subr.bf16.mxu0 %v2673_v58  ;;  %v2712_v4 = vld [vmem:[#allocation8 + $0xd4] ss:$8 sps:$4 sm:$0xff]   ;;  %v2707_v58 = vld [vmem:[#allocation6 + $0xd0] ss:$8 sps:$4 sm:$0xff]  }
  0xb9   :  { %1528 = vmatprep.subr.bf16.mxu1 %v2676_v63  ;;  %v2710_v63 = vld [vmem:[#allocation8 + $0xd0] ss:$8 sps:$4 sm:$0xff]  }
  0xbb   :  { %1317 = vmatpush1.bf16.msra.mxu0 %v2671_v2  ;;  %v2715_v2 = vld [vmem:[#allocation6 + $0xc4] ss:$8 sps:$4 sm:$0xff]  }
  0xbc   :  { %1529 = vmatpush1.bf16.msra.mxu1 %v2674_v3  ;;  %1318 = vmatprep.subr.bf16.mxu0 %v2679_v59  ;;  %v2718_v3 = vld [vmem:[#allocation8 + $0xc4] ss:$8 sps:$4 sm:$0xff]   ;;  %v2713_v59 = vld [vmem:[#allocation6 + $0xc0] ss:$8 sps:$4 sm:$0xff]  }
  0xbd   :  { %1530 = vmatprep.subr.bf16.mxu1 %v2682_v5  ;;  %v2716_v5 = vld [vmem:[#allocation8 + $0xc0] ss:$8 sps:$4 sm:$0xff]  }
  0xbf   :  { %1319 = vmatpush1.bf16.msra.mxu0 %v2677_v6  ;;  %v2721_v6 = vld [vmem:[#allocation6 + $0xb4] ss:$8 sps:$4 sm:$0xff]  }
  0xc0   :  { %1531 = vmatpush1.bf16.msra.mxu1 %v2680_v9  ;;  %1320 = vmatprep.subr.bf16.mxu0 %v2685_v29  ;;  %v2724_v9 = vld [vmem:[#allocation8 + $0xb4] ss:$8 sps:$4 sm:$0xff]   ;;  %v2719_v29 = vld [vmem:[#allocation6 + $0xb0] ss:$8 sps:$4 sm:$0xff]  }
  0xc1   :  { %1532 = vmatprep.subr.bf16.mxu1 %v2688_v13  ;;  %v2722_v13 = vld [vmem:[#allocation8 + $0xb0] ss:$8 sps:$4 sm:$0xff]  }
  0xc3   :  { %1321 = vmatpush1.bf16.msra.mxu0 %v2683_v16  ;;  %v2727_v16 = vld [vmem:[#allocation6 + $0xa4] ss:$8 sps:$4 sm:$0xff]  }
  0xc4   :  { %1533 = vmatpush1.bf16.msra.mxu1 %v2686_v30  ;;  %1322 = vmatprep.subr.bf16.mxu0 %v2691_v18  ;;  %v2730_v30 = vld [vmem:[#allocation8 + $0xa4] ss:$8 sps:$4 sm:$0xff]   ;;  %v2725_v18 = vld [vmem:[#allocation6 + $0xa0] ss:$8 sps:$4 sm:$0xff]  }
  0xc5   :  { %1534 = vmatprep.subr.bf16.mxu1 %v2694_v20  ;;  %v2728_v20 = vld [vmem:[#allocation8 + $0xa0] ss:$8 sps:$4 sm:$0xff]  }
  0xc7   :  { %1323 = vmatpush1.bf16.msra.mxu0 %v2689_v31  ;;  %v2733_v31 = vld [vmem:[#allocation6 + $0x94] ss:$8 sps:$4 sm:$0xff]  }
  0xc8   :  { %1535 = vmatpush1.bf16.msra.mxu1 %v2692_v35  ;;  %1324 = vmatprep.subr.bf16.mxu0 %v2697_v41  ;;  %v2736_v35 = vld [vmem:[#allocation8 + $0x94] ss:$8 sps:$4 sm:$0xff]   ;;  %v2731_v41 = vld [vmem:[#allocation6 + $0x90] ss:$8 sps:$4 sm:$0xff]  }
  0xc9   :  { %1536 = vmatprep.subr.bf16.mxu1 %v2700_v47  ;;  %v2734_v47 = vld [vmem:[#allocation8 + $0x90] ss:$8 sps:$4 sm:$0xff]  }
  0xcb   :  { %1325 = vmatpush2.bf16.msra.mxu0 %v2695_v48  ;;  %v2739_v48 = vld [vmem:[#allocation6 + $0x84] ss:$8 sps:$4 sm:$0xff]  }
  0xcc   :  { %1537 = vmatpush2.bf16.msra.mxu1 %v2698_v44  ;;  %1326 = vmatprep.subr.bf16.mxu0 %v2703_v32  ;;  %v2742_v44 = vld [vmem:[#allocation8 + $0x84] ss:$8 sps:$4 sm:$0xff]   ;;  %v2737_v32 = vld [vmem:[#allocation6 + $0x80] ss:$8 sps:$4 sm:$0xff]  }
  0xcd   :  { %1538 = vmatprep.subr.bf16.mxu1 %v2706_v40  ;;  %v2740_v40 = vld [vmem:[#allocation8 + $0x80] ss:$8 sps:$4 sm:$0xff]  }
  0xcf   :  { %1327 = vmatpush2.bf16.msra.mxu0 %v2701_v49  ;;  %v281_v49 = vld [vmem:[%s3452_s5] sm:$0xf] }
  0xd0   :  { %1539 = vmatpush2.bf16.msra.mxu1 %v2704_v53  ;;  %1328 = vmatprep.subr.bf16.mxu0 %v2709_v60  ;;  %v2783_v53 = vld [vmem:[#allocation4 + $0xe0] sm:$0xff] }
  0xd1   :  { %1540 = vmatprep.subr.bf16.mxu1 %v2712_v4  ;;  %v1681_v60 = vunpack.c.l.bf16 %v2783_v53  ;;  %v2784_v4 = vld [vmem:[#allocation4 + $0xf0] sm:$0xff] }
  0xd3   :  { %1329 = vmatpush2.bf16.msra.mxu0 %v2707_v58  ;;  %v1685_v58 = vunpack.c.l.bf16 %v2784_v4 }
  0xd4   :  { %1541 = vmatpush2.bf16.msra.mxu1 %v2710_v63  ;;  %1330 = vmatprep.subr.bf16.mxu0 %v2715_v2  ;;  %v2785_v63 = vld [vmem:[#allocation4 + $0x2e0] sm:$0xff] }
  0xd5   :  { %1542 = vmatprep.subr.bf16.mxu1 %v2718_v3  ;;  %v1809_v2 = vunpack.c.l.bf16 %v2785_v63  ;;  %v2786_v3 = vld [vmem:[#allocation4 + $0x2f0] sm:$0xff] }
  0xd7   :  { %1331 = vmatpush2.bf16.msra.mxu0 %v2713_v59  ;;  %v1813_v59 = vunpack.c.l.bf16 %v2786_v3 }
  0xd8   :  { %1543 = vmatpush2.bf16.msra.mxu1 %v2716_v5  ;;  %1332 = vmatprep.subr.bf16.mxu0 %v2721_v6  ;;  %v3281_v5 = vrot.slane %v281_v49, %v3113_v10  ;;  %v3284_v6 = vrot.slane %v281_v49, %v3093_v50  ;;  %v2788_v10 = vld [vmem:[#allocation4 + $0xd0] sm:$0xff] }
  0xd9   :  { %1544 = vmatprep.subr.bf16.mxu1 %v2724_v9  ;;  %v1810_v9 = vunpack.c.h.bf16 %v2785_v63 }
  0xdb   :  { %1333 = vmatpush2.bf16.msra.mxu0 %v2719_v29  ;;  %v1814_v29 = vunpack.c.h.bf16 %v2786_v3  ;;  %v2787_v3 = vld [vmem:[#allocation4 + $0xc0] sm:$0xff] }
  0xdc   :  { %1545 = vmatpush2.bf16.msra.mxu1 %v2722_v13  ;;  %1334 = vmatprep.subr.bf16.mxu0 %v2727_v16  ;;  %v1684_v13 = vunpack.c.h.bf16 %v3115_v14  ;;  %v1688_v16 = vunpack.c.h.bf16 %v3117_v15  ;;  %v1674_v50 = vunpack.c.h.bf16 %v2787_v3 }
  0xdd   :  { %1546 = vmatprep.subr.bf16.mxu1 %v2730_v30  ;;  %v1812_v30 = vunpack.c.h.bf16 %v3119_v17 }
  0xdf   :  { %1335 = vmatpush2.bf16.msra.mxu0 %v2725_v18  ;;  %v1816_v18 = vunpack.c.h.bf16 %v3123_v19 }
  0xe0   :  { %1547 = vmatpush2.bf16.msra.mxu1 %v2728_v20  ;;  %1336 = vmatprep.subr.bf16.mxu0 %v2733_v31 }
  0xe1   :  { %1548 = vmatprep.subr.bf16.mxu1 %v2736_v35  ;;  %v1937_v35 = vadd.f32 %v1809_v2, %v1681_v60 }
  0xe3   :  { %1337 = vmatpush2.bf16.msra.mxu0 %v2731_v41  ;;  %v1941_v41 = vadd.f32 %v1813_v59, %v1685_v58  ;;  %v2790_v59 = vld [vmem:[#allocation4 + $0x2d0] sm:$0xff] }
  0xe4   :  { %1549 = vmatpush2.bf16.msra.mxu1 %v2734_v47  ;;  %1338 = vmatprep.subr.bf16.mxu0 %v2739_v48  ;;  %v1940_v47 = vadd.f32 %v1812_v30, %v1684_v13  ;;  %v1944_v48 = vadd.f32 %v1816_v18, %v1688_v16  ;;  %v1673_v30 = vunpack.c.l.bf16 %v2787_v3  ;;  %v1677_v18 = vunpack.c.l.bf16 %v2788_v10  ;;  %v2792_v3 = vld [vmem:[#allocation4 + $0xb0] sm:$0xff] }
  0xe5   :  { %1550 = vmatprep.subr.bf16.mxu1 %v2742_v44  ;;  %v1683_v44 = vunpack.c.l.bf16 %v3115_v14  ;;  %v2037_v49 = vpack.c.bf16 %v1941_v41, %v1937_v35  ;;  %v1806_v14 = vunpack.c.h.bf16 %v2790_v59  ;;  %v1805_v41 = vunpack.c.l.bf16 %v2790_v59 }
  0xe6   :  { %v2040_v63 = vpack.c.bf16 %v1944_v48, %v1940_v47  ;;  %v1675_v48 = vunpack.c.l.bf16 %v3129_v24 }
  0xe7   :  { %1339 = vmatpush2.bf16.msra.mxu0 %v2737_v32  ;;  %v1687_v32 = vunpack.c.l.bf16 %v3117_v15  ;;  %v1676_v15 = vunpack.c.h.bf16 %v3129_v24 }
  0xe8   :  { %1551 = vmatpush2.bf16.msra.mxu1 %v2740_v40 }
  0xe9   :  { %2116 = vmatprep.subr.bf16.mxu1 %v2040_v63 }
  0xea   :  { %1341 = vmatmul.mubr.bf16.vlgmr.msra.gmra.mxu0 %v3137_v27  ;;  %v1682_v27 = vunpack.c.h.bf16 %v2783_v53  ;;  %v1811_v53 = vunpack.c.l.bf16 %v3119_v17  ;;  %v1680_v17 = vunpack.c.h.bf16 %v3131_v25 }
  0xeb   :  { %1553 = vmatmul.mubr.bf16.vlgmr.msra.gmra.mxu1 %v3141_v57  ;;  %v1686_v57 = vunpack.c.h.bf16 %v2784_v4  ;;  %v1815_v4 = vunpack.c.l.bf16 %v3123_v19  ;;  %v1804_v19 = vunpack.c.h.bf16 %v3135_v26 }
  0xec   :  { %v1938_v20 = vadd.f32 %v1810_v9, %v1682_v27  ;;  %v1678_v27 = vunpack.c.h.bf16 %v2788_v10  ;;  %v1939_v58 = vadd.f32 %v1811_v53, %v1683_v44  ;;  %v1803_v44 = vunpack.c.l.bf16 %v3135_v26  ;;  %v2791_v10 = vld [vmem:[#allocation4 + $0xa0] sm:$0xff] }
  0xed   :  { %v1942_v31 = vadd.f32 %v1814_v29, %v1686_v57  ;;  %v2789_v57 = vld [vmem:[#allocation4 + $0x2c0] sm:$0xff]  ;;  %v1943_v2 = vadd.f32 %v1815_v4, %v1687_v32  ;;  %v1808_v29 = vunpack.c.h.bf16 %v3139_v28  ;;  %v1807_v53 = vunpack.c.l.bf16 %v3139_v28 }
  0xee   :  { %v1802_v60 = vunpack.c.h.bf16 %v2789_v57  ;;  %v1934_v16 = vadd.f32 %v1806_v14, %v1678_v27  ;;  %v1801_v35 = vunpack.c.l.bf16 %v2789_v57  ;;  %v1931_v4 = vadd.f32 %v1803_v44, %v1675_v48  ;;  %v2793_v57 = vld [vmem:[#allocation4 + $0x2a0] sm:$0xff] }
  0xef   :  { %v2038_v40 = vpack.c.bf16 %v1942_v31, %v1938_v20  ;;  %v2039_v13 = vpack.c.bf16 %v1943_v2, %v1939_v58  ;;  %v1932_v20 = vadd.f32 %v1804_v19, %v1676_v15  ;;  %v1936_v31 = vadd.f32 %v1808_v29, %v1680_v17  ;;  %v2794_v2 = vld [vmem:[#allocation4 + $0x2b0] sm:$0xff] }
  0xf0   :  { %v1930_v9 = vadd.f32 %v1802_v60, %v1674_v50  ;;  %v1679_v50 = vunpack.c.l.bf16 %v3131_v25  ;;  %v1666_v63 = vunpack.c.h.bf16 %v2791_v10  ;;  %v1670_v27 = vunpack.c.h.bf16 %v2792_v3 }
  0xf1   :  { %2075 = vmatprep.subr.bf16.mxu0 %v2038_v40  ;;  %2117 = vmatpush1.bf16.msra.mxu1 %v2039_v13  ;;  %v2036_v32 = vpack.c.bf16 %v1936_v31, %v1932_v20  ;;  %v1929_v40 = vadd.f32 %v1801_v35, %v1673_v30  ;;  %v1794_v60 = vunpack.c.h.bf16 %v2793_v57  ;;  %v1798_v25 = vunpack.c.h.bf16 %v2794_v2 }
  0xf2   :  { %2076 = vmatpush1.bf16.msra.mxu0 %v2037_v49  ;;  %v2034_v47 = vpack.c.bf16 %v1934_v16, %v1930_v9  ;;  %v1933_v49 = vadd.f32 %v1805_v41, %v1677_v18  ;;  %v1935_v24 = vadd.f32 %v1807_v53, %v1679_v50  ;;  %v1668_v26 = vunpack.c.h.bf16 %v3149_v33  ;;  %v2796_v53 = vld [vmem:[#allocation4 + $0x90] sm:$0xff] }
  0xf3   :  { %2118 = vmatprep.subr.bf16.mxu1 %v2036_v32  ;;  %v1922_v59 = vadd.f32 %v1794_v60, %v1666_v63  ;;  %v1672_v14 = vunpack.c.h.bf16 %v3151_v34  ;;  %v1796_v28 = vunpack.c.h.bf16 %v3155_v36  ;;  %v1800_v15 = vunpack.c.h.bf16 %v3158_v37 }
  0xf4   :  { %2077 = vmatprep.subr.bf16.mxu0 %v2034_v47  ;;  %v2033_v58 = vpack.c.bf16 %v1933_v49, %v1929_v40  ;;  %v2035_v9 = vpack.c.bf16 %v1935_v24, %v1931_v4  ;;  %v1926_v17 = vadd.f32 %v1798_v25, %v1670_v27  ;;  %v1665_v19 = vunpack.c.l.bf16 %v2791_v10  ;;  %v2795_v40 = vld [vmem:[#allocation4 + $0x80] sm:$0xff]  ;;  %v2798_v27 = vld [vmem:[#allocation4 + $0x290] sm:$0xff] }
  0xf5   :  { %v1669_v29 = vunpack.c.l.bf16 %v2792_v3  ;;  %v1924_v13 = vadd.f32 %v1796_v28, %v1668_v26  ;;  %v1928_v16 = vadd.f32 %v1800_v15, %v1672_v14  ;;  %v1793_v30 = vunpack.c.l.bf16 %v2793_v57  ;;  %v2797_v10 = vld [vmem:[#allocation4 + $0x280] sm:$0xff] }
  0xf6   :  { %2078 = vmatpush1.bf16.msra.mxu0 %v2033_v58  ;;  %v1797_v18 = vunpack.c.l.bf16 %v2794_v2  ;;  %2119 = vmatpush1.bf16.msra.mxu1 %v2035_v9  ;;  %v2030_v20 = vpack.c.bf16 %v1926_v17, %v1922_v59  ;;  %v1667_v31 = vunpack.c.l.bf16 %v3149_v33  ;;  %v1671_v35 = vunpack.c.l.bf16 %v3151_v34 }
  0xf7   :  { %v1795_v41 = vunpack.c.l.bf16 %v3155_v36  ;;  %v2032_v47 = vpack.c.bf16 %v1928_v16, %v1924_v13  ;;  %v1921_v48 = vadd.f32 %v1793_v30, %v1665_v19  ;;  %v1799_v44 = vunpack.c.l.bf16 %v3158_v37 }
  0xf8   :  { %v1925_v50 = vadd.f32 %v1797_v18, %v1669_v29  ;;  %2079 = vmatprep.subr.bf16.mxu0 %v2030_v20  ;;  %v1658_v49 = vunpack.c.h.bf16 %v2795_v40  ;;  %v1662_v4 = vunpack.c.h.bf16 %v2796_v53  ;;  %v1786_v63 = vunpack.c.h.bf16 %v2797_v10 }
  0xf9   :  { %v1923_v32 = vadd.f32 %v1795_v41, %v1667_v31  ;;  %2120 = vmatprep.subr.bf16.mxu1 %v2032_v47  ;;  %v1927_v33 = vadd.f32 %v1799_v44, %v1671_v35  ;;  %v1790_v34 = vunpack.c.h.bf16 %v2798_v27  ;;  %v1660_v36 = vunpack.c.h.bf16 %v3167_v42  ;;  %v2799_v31 = vld [vmem:[#allocation4 + $0x60] sm:$0xff]  ;;  %v2800_v41 = vld [vmem:[#allocation4 + $0x70] sm:$0xff] }
  0xfa   :  { %v2029_v3 = vpack.c.bf16 %v1925_v50, %v1921_v48  ;;  %v1914_v57 = vadd.f32 %v1786_v63, %v1658_v49  ;;  %v1664_v60 = vunpack.c.h.bf16 %v3169_v43  ;;  %v1788_v37 = vunpack.c.h.bf16 %v3173_v45  ;;  %v2801_v48 = vld [vmem:[#allocation4 + $0x260] sm:$0xff] }
  0xfb   :  { %v1792_v58 = vunpack.c.h.bf16 %v3176_v46  ;;  %v2031_v24 = vpack.c.bf16 %v1927_v33, %v1923_v32  ;;  %v1918_v2 = vadd.f32 %v1790_v34, %v1662_v4  ;;  %v1657_v25 = vunpack.c.l.bf16 %v2795_v40  ;;  %v2802_v32 = vld [vmem:[#allocation4 + $0x270] sm:$0xff] }
  0xfc   :  { %2080 = vmatpush1.bf16.msra.mxu0 %v2029_v3  ;;  %v1661_v26 = vunpack.c.l.bf16 %v2796_v53  ;;  %v1916_v59 = vadd.f32 %v1788_v37, %v1660_v36  ;;  %v1785_v28 = vunpack.c.l.bf16 %v2797_v10  ;;  %v1789_v15 = vunpack.c.l.bf16 %v2798_v27 }
  0xfd   :  { %v1920_v14 = vadd.f32 %v1792_v58, %v1664_v60  ;;  %2121 = vmatpush1.bf16.msra.mxu1 %v2031_v24  ;;  %v2026_v9 = vpack.c.bf16 %v1918_v2, %v1914_v57  ;;  %v1659_v17 = vunpack.c.l.bf16 %v3167_v42  ;;  %v1663_v19 = vunpack.c.l.bf16 %v3169_v43 }
  0xfe   :  { %v1787_v29 = vunpack.c.l.bf16 %v3173_v45  ;;  %v1913_v16 = vadd.f32 %v1785_v28, %v1657_v25  ;;  %v1917_v30 = vadd.f32 %v1789_v15, %v1661_v26  ;;  %v1791_v18 = vunpack.c.l.bf16 %v3176_v46  ;;  %v2804_v15 = vld [vmem:[#allocation4 + $0x50] sm:$0xff] }
  0xff   :  { %v2028_v13 = vpack.c.bf16 %v1920_v14, %v1916_v59  ;;  %2081 = vmatprep.subr.bf16.mxu0 %v2026_v9  ;;  %v1650_v35 = vunpack.c.h.bf16 %v2799_v31  ;;  %v1654_v47 = vunpack.c.h.bf16 %v2800_v41  ;;  %v1778_v50 = vunpack.c.h.bf16 %v2801_v48  ;;  %v2803_v14 = vld [vmem:[#allocation4 + $0x40] sm:$0xff] }
 0x100   :  { %v1915_v20 = vadd.f32 %v1787_v29, %v1659_v17  ;;  %v2025_v44 = vpack.c.bf16 %v1917_v30, %v1913_v16  ;;  %v1919_v42 = vadd.f32 %v1791_v18, %v1663_v19  ;;  %v1782_v43 = vunpack.c.h.bf16 %v2802_v32  ;;  %v2805_v17 = vld [vmem:[#allocation4 + $0x240] sm:$0xff] }
 0x101   :  { %2122 = vmatprep.subr.bf16.mxu1 %v2028_v13  ;;  %v1652_v45 = vunpack.c.h.bf16 %v3185_v51  ;;  %v1906_v40 = vadd.f32 %v1778_v50, %v1650_v35  ;;  %v1656_v49 = vunpack.c.h.bf16 %v3187_v52  ;;  %v1780_v46 = vunpack.c.h.bf16 %v3191_v54  ;;  %v2806_v13 = vld [vmem:[#allocation4 + $0x250] sm:$0xff] }
 0x102   :  { %v1784_v53 = vunpack.c.h.bf16 %v3193_v55  ;;  %2082 = vmatpush1.bf16.msra.mxu0 %v2025_v44  ;;  %v2027_v4 = vpack.c.bf16 %v1919_v42, %v1915_v20  ;;  %v1910_v10 = vadd.f32 %v1782_v43, %v1654_v47  ;;  %v1649_v63 = vunpack.c.l.bf16 %v2799_v31 }
 0x103   :  { %v1653_v3 = vunpack.c.l.bf16 %v2800_v41  ;;  %v1908_v33 = vadd.f32 %v1780_v46, %v1652_v45  ;;  %v1777_v34 = vunpack.c.l.bf16 %v2801_v48  ;;  %v1781_v36 = vunpack.c.l.bf16 %v2802_v32 }
 0x104   :  { %v1912_v27 = vadd.f32 %v1784_v53, %v1656_v49  ;;  %2123 = vmatpush1.bf16.msra.mxu1 %v2027_v4  ;;  %v2022_v57 = vpack.c.bf16 %v1910_v10, %v1906_v40  ;;  %v1651_v60 = vunpack.c.l.bf16 %v3185_v51  ;;  %v1655_v37 = vunpack.c.l.bf16 %v3187_v52 }
 0x105   :  { %v1779_v58 = vunpack.c.l.bf16 %v3191_v54  ;;  %v1905_v2 = vadd.f32 %v1777_v34, %v1649_v63  ;;  %v1909_v25 = vadd.f32 %v1781_v36, %v1653_v3  ;;  %v1783_v26 = vunpack.c.l.bf16 %v3193_v55  ;;  %v2808_v34 = vld [vmem:[#allocation4 + $0x30] sm:$0xff] }
 0x106   :  { %v2024_v24 = vpack.c.bf16 %v1912_v27, %v1908_v33  ;;  %2083 = vmatprep.subr.bf16.mxu0 %v2022_v57  ;;  %v1642_v28 = vunpack.c.h.bf16 %v2803_v14  ;;  %v1646_v9 = vunpack.c.h.bf16 %v2804_v15  ;;  %v1770_v19 = vunpack.c.h.bf16 %v2805_v17  ;;  %v2807_v33 = vld [vmem:[#allocation4 + $0x20] sm:$0xff] }
 0x107   :  { %v1907_v59 = vadd.f32 %v1779_v58, %v1651_v60  ;;  %v2021_v29 = vpack.c.bf16 %v1909_v25, %v1905_v2  ;;  %v1911_v51 = vadd.f32 %v1783_v26, %v1655_v37  ;;  %v1774_v52 = vunpack.c.h.bf16 %v2806_v13  ;;  %v2810_v37 = vld [vmem:[#allocation4 + $0x230] sm:$0xff] }
 0x108   :  { %2124 = vmatprep.subr.bf16.mxu1 %v2024_v24  ;;  %v1644_v54 = vunpack.c.h.bf16 %v3201_v61  ;;  %v1898_v16 = vadd.f32 %v1770_v19, %v1642_v28  ;;  %v1648_v30 = vunpack.c.h.bf16 %v3203_v62  ;;  %v1772_v55 = vunpack.c.h.bf16 %v3207_v0 }
 0x109   :  { %v1776_v18 = vunpack.c.h.bf16 %v3209_v1  ;;  %2084 = vmatpush1.bf16.msra.mxu0 %v2021_v29  ;;  %v2023_v20 = vpack.c.bf16 %v1911_v51, %v1907_v59  ;;  %v1902_v31 = vadd.f32 %v1774_v52, %v1646_v9  ;;  %v1641_v35 = vunpack.c.l.bf16 %v2803_v14 }
 0x10a   :  { %v1645_v41 = vunpack.c.l.bf16 %v2804_v15  ;;  %v1900_v47 = vadd.f32 %v1772_v55, %v1644_v54  ;;  %v1769_v50 = vunpack.c.l.bf16 %v2805_v17  ;;  %v1773_v44 = vunpack.c.l.bf16 %v2806_v13 }
 0x10b   :  { %v1904_v48 = vadd.f32 %v1776_v18, %v1648_v30  ;;  %2125 = vmatpush1.bf16.msra.mxu1 %v2023_v20  ;;  %v2018_v42 = vpack.c.bf16 %v1902_v31, %v1898_v16  ;;  %v1643_v32 = vunpack.c.l.bf16 %v3201_v61  ;;  %v1647_v43 = vunpack.c.l.bf16 %v3203_v62 }
 0x10c   :  { %v1771_v45 = vunpack.c.l.bf16 %v3207_v0  ;;  %v1897_v46 = vadd.f32 %v1769_v50, %v1641_v35  ;;  %v1901_v53 = vadd.f32 %v1773_v44, %v1645_v41  ;;  %v1775_v4 = vunpack.c.l.bf16 %v3209_v1  ;;  %v2809_v0 = vld [vmem:[#allocation4 + $0x220] sm:$0xff] }
 0x10d   :  { %v2020_v49 = vpack.c.bf16 %v1904_v48, %v1900_v47  ;;  %2085 = vmatprep.subr.bf16.mxu0 %v2018_v42  ;;  %v1634_v27 = vunpack.c.h.bf16 %v2807_v33  ;;  %v1638_v36 = vunpack.c.h.bf16 %v2808_v34  ;;  %v1762_v60 = vunpack.c.h.bf16 %v2809_v0 }
 0x10e   :  { %v1899_v3 = vadd.f32 %v1771_v45, %v1643_v32  ;;  %v2017_v62 = vpack.c.bf16 %v1901_v53, %v1897_v46  ;;  %v1903_v57 = vadd.f32 %v1775_v4, %v1647_v43  ;;  %v1766_v58 = vunpack.c.h.bf16 %v2810_v37  ;;  %v2811_v43 = vld [vmem:[#allocation4] sm:$0xff] }
 0x10f   :  { %2126 = vmatprep.subr.bf16.mxu1 %v2020_v49  ;;  %v1636_v25 = vunpack.c.h.bf16 %v3217_v7  ;;  %v1640_v26 = vunpack.c.h.bf16 %v3219_v8  ;;  %v1890_v28 = vadd.f32 %v1762_v60, %v1634_v27  ;;  %v1764_v9 = vunpack.c.h.bf16 %v3223_v11  ;;  %v2813_v53 = vld [vmem:[#allocation4 + $0x200] sm:$0xff] }
 0x110   :  { %2086 = vmatpush1.bf16.msra.mxu0 %v2017_v62  ;;  %v2019_v14 = vpack.c.bf16 %v1903_v57, %v1899_v3  ;;  %v1894_v15 = vadd.f32 %v1766_v58, %v1638_v36  ;;  %v1768_v29 = vunpack.c.h.bf16 %v3225_v12  ;;  %v1633_v54 = vunpack.c.l.bf16 %v2807_v33 }
 0x111   :  { %v1892_v52 = vadd.f32 %v1764_v9, %v1636_v25  ;;  %v1637_v55 = vunpack.c.l.bf16 %v2808_v34  ;;  %v1761_v18 = vunpack.c.l.bf16 %v2809_v0  ;;  %v1765_v20 = vunpack.c.l.bf16 %v2810_v37  ;;  %v2816_v9 = vld [vmem:[#allocation4 + $0x1f0] sm:$0xff] }
 0x112   :  { %2127 = vmatpush1.bf16.msra.mxu1 %v2019_v14  ;;  %v2014_v13 = vpack.c.bf16 %v1894_v15, %v1890_v28  ;;  %v1896_v30 = vadd.f32 %v1768_v29, %v1640_v26  ;;  %v1635_v31 = vunpack.c.l.bf16 %v3217_v7  ;;  %v1639_v35 = vunpack.c.l.bf16 %v3219_v8  ;;  %v2814_v7 = vld [vmem:[#allocation4 + $0x210] sm:$0xff]  ;;  %v2815_v28 = vld [vmem:[#allocation4 + $0x1e0] sm:$0xff] }
 0x113   :  { %v1763_v47 = vunpack.c.l.bf16 %v3223_v11  ;;  %v1767_v48 = vunpack.c.l.bf16 %v3225_v12  ;;  %v1889_v50 = vadd.f32 %v1761_v18, %v1633_v54  ;;  %v1893_v44 = vadd.f32 %v1765_v20, %v1637_v55  ;;  %v2817_v29 = vld [vmem:[#allocation4 + $0x3e0] sm:$0xff] }
 0x114   :  { %2087 = vmatprep.subr.bf16.mxu0 %v2014_v13  ;;  %v2016_v41 = vpack.c.bf16 %v1896_v30, %v1892_v52  ;;  %v1626_v45 = vunpack.c.h.bf16 %v2811_v43  ;;  %v1754_v4 = vunpack.c.h.bf16 %v2813_v53  ;;  %v1628_v8 = vunpack.c.h.bf16 %v3235_v21  ;;  %v2818_v52 = vld [vmem:[#allocation4 + $0x3f0] sm:$0xff]  ;;  %v3471_v30 = vld [vmem:[#allocation14_spill] sm:$0xff]  ;;  %v3472_v55 = vld [vmem:[#allocation15_spill] sm:$0xff] }
 0x115   :  { %v1891_v42 = vadd.f32 %v1763_v47, %v1635_v31  ;;  %v1895_v32 = vadd.f32 %v1767_v48, %v1639_v35  ;;  %v2013_v46 = vpack.c.bf16 %v1893_v44, %v1889_v50  ;;  %v1632_v11 = vunpack.c.h.bf16 %v3237_v22 }
 0x116   :  { %2128 = vmatprep.subr.bf16.mxu1 %v2016_v41  ;;  %v1756_v12 = vunpack.c.h.bf16 %v3239_v23  ;;  %v1760_v3 = vunpack.c.h.bf16 %v3241_v56  ;;  %v1882_v33 = vadd.f32 %v1754_v4, %v1626_v45  ;;  %v1625_v34 = vunpack.c.l.bf16 %v2811_v43  ;;  %v2819_v43 = vld [vmem:[#allocation4 + $0x1e8] sm:$0xff]  ;;  %v2822_v4 = vld [vmem:[#allocation4 + $0x3f8] sm:$0xff] }
 0x117   :  { %2088 = vmatpush1.bf16.msra.mxu0 %v2013_v46  ;;  %v1753_v57 = vunpack.c.l.bf16 %v2813_v53  ;;  %v1757_v0 = vunpack.c.l.bf16 %v2814_v7  ;;  %v1627_v37 = vunpack.c.l.bf16 %v3235_v21  ;;  %v1631_v58 = vunpack.c.l.bf16 %v3237_v22  ;;  %v2821_v46 = vld [vmem:[#allocation4 + $0x3e8] sm:$0xff] }
 0x118   :  { %v1888_v62 = vadd.f32 %v1760_v3, %v1632_v11  ;;  %v1746_v15 = vunpack.c.h.bf16 %v2815_v28  ;;  %v1878_v22 = vunpack.c.h.bf16 %v2818_v52  ;;  %v1880_v18 = vunpack.c.h.bf16 %v3472_v55 }
 0x119   :  { %v1881_v25 = vadd.f32 %v1753_v57, %v1625_v34  ;;  %v1745_v35 = vunpack.c.l.bf16 %v2815_v28  ;;  %v1749_v48 = vunpack.c.l.bf16 %v2816_v9  ;;  %v1873_v50 = vunpack.c.l.bf16 %v2817_v29 }
 0x11a   :  { %v1747_v45 = vunpack.c.l.bf16 %v2819_v43  ;;  %v1875_v53 = vunpack.c.l.bf16 %v2821_v46 }
 0x12a   :  { %v1007_v40 = vpop.f32.mrf.mxu0 }
 0x12b   :  { %v1008_v10 = vadd.f32 %v1007_v40, %v3281_v5  ;;  %v1048_v63 = vpop.f32.mrf.mxu1  ;;  %v2812_v40 = vld [vmem:[#allocation4 + $0x10] sm:$0xff] }
 0x12c   :  { %v1009_v61 = vpop.f32.mrf.mxu0  ;;  %v1630_v49 = vunpack.c.h.bf16 %v2812_v40  ;;  %v1629_v36 = vunpack.c.l.bf16 %v2812_v40 }
 0x12d   :  { %v3335_v24 = vadd.f32 %v1048_v63, %v1008_v10  ;;  %v1010_v1 = vadd.f32 %v1009_v61, %v3284_v6  ;;  %v1050_v2 = vpop.f32.mrf.mxu1  ;;  %v1758_v10 = vunpack.c.h.bf16 %v2814_v7  ;;  %v2015_v63 = vpack.c.bf16 %v1895_v32, %v1891_v42 }
 0x12e   :  { %v1011_v59 = vpop.f32.mrf.mxu0  ;;  %v1884_v61 = vadd.f32 %v1756_v12, %v1628_v8  ;;  %v1885_v26 = vadd.f32 %v1757_v0, %v1629_v36  ;;  %v1877_v42 = vunpack.c.l.bf16 %v2818_v52  ;;  %v1879_v7 = vunpack.c.l.bf16 %v2822_v4  ;;  %v2825_v12 = vld [vmem:[#allocation4 + $0x3c0] sm:$0xff] }
 0x12f   :  { %v3341_v17 = vadd.f32 %v1050_v2, %v1010_v1  ;;  %v1052_v19 = vpop.f32.mrf.mxu1  ;;  %v1886_v27 = vadd.f32 %v1758_v10, %v1630_v49  ;;  %2129 = vmatpush1.bf16.msra.mxu1 %v2015_v63  ;;  %v1755_v1 = vunpack.c.l.bf16 %v3239_v23  ;;  %v1759_v59 = vunpack.c.l.bf16 %v3241_v56  ;;  %v2823_v10 = vld [vmem:[#allocation4 + $0x1c0] sm:$0xff]  ;;  %v2824_v63 = vld [vmem:[#allocation4 + $0x1d0] sm:$0xff] }
 0x130   :  { %v1012_v51 = vpop.f32.mrf.mxu0  ;;  %v2012_v2 = vpack.c.bf16 %v1888_v62, %v1884_v61  ;;  %v1750_v19 = vunpack.c.h.bf16 %v2816_v9  ;;  %v2009_v13 = vpack.c.bf16 %v1885_v26, %v1881_v25  ;;  %v1748_v23 = vunpack.c.h.bf16 %v3251_v38  ;;  %v2827_v62 = vld [vmem:[#allocation4 + $0x1c8] sm:$0xff]  ;;  %v2830_v26 = vld [vmem:[#allocation4 + $0x3d8] sm:$0xff] }
 0x131   :  { %v1053_v16 = vpop.f32.mrf.mxu1  ;;  %v2010_v60 = vpack.c.bf16 %v1886_v27, %v1882_v33  ;;  %v1883_v14 = vadd.f32 %v1755_v1, %v1627_v37  ;;  %v1874_v51 = vunpack.c.h.bf16 %v2817_v29  ;;  %v1887_v21 = vadd.f32 %v1759_v59, %v1631_v58  ;;  %v2826_v33 = vld [vmem:[#allocation4 + $0x3d0] sm:$0xff]  ;;  %v2828_v37 = vld [vmem:[#allocation4 + $0x1d8] sm:$0xff]  ;;  %v2829_v1 = vld [vmem:[#allocation4 + $0x3c8] sm:$0xff] }
 0x132   :  { %2130 = vmatprep.subr.bf16.mxu1 %v2012_v2  ;;  %v1752_v16 = vunpack.c.h.bf16 %v3253_v39  ;;  %v1876_v56 = vunpack.c.h.bf16 %v3471_v30  ;;  %v2006_v31 = vadd.f32 %v1878_v22, %v1750_v19  ;;  %v2001_v38 = vadd.f32 %v1873_v50, %v1745_v35  ;;  %v2820_v39 = vld [vmem:[#allocation4 + $0x1f8] sm:$0xff] }
 0x133   :  { %2089 = vmatprep.subr.bf16.mxu0 %v2010_v60  ;;  %v2002_v54 = vadd.f32 %v1874_v51, %v1746_v15  ;;  %v2011_v20 = vpack.c.bf16 %v1887_v21, %v1883_v14  ;;  %v1751_v40 = vunpack.c.l.bf16 %v2820_v39  ;;  %v2005_v49 = vadd.f32 %v1877_v42, %v1749_v48  ;;  %v2834_v48 = vld [vmem:[#allocation4 + $0x3b0] sm:$0xff] }
 0x134   :  { %2090 = vmatpush1.bf16.msra.mxu0 %v2009_v13  ;;  %v2004_v41 = vadd.f32 %v1876_v56, %v1748_v23  ;;  %v2008_v47 = vadd.f32 %v1880_v18, %v1752_v16  ;;  %v1738_v8 = vunpack.c.h.bf16 %v2823_v10  ;;  %v1742_v11 = vunpack.c.h.bf16 %v2824_v63  ;;  %v2831_v16 = vld [vmem:[#allocation4 + $0x1a0] sm:$0xff]  ;;  %v2832_v18 = vld [vmem:[#allocation4 + $0x1b0] sm:$0xff] }
 0x135   :  { %2131 = vmatpush1.bf16.msra.mxu1 %v2011_v20  ;;  %v2070_v44 = vpack.c.bf16 %v2006_v31, %v2002_v54  ;;  %v1866_v3 = vunpack.c.h.bf16 %v2825_v12  ;;  %v1870_v27 = vunpack.c.h.bf16 %v2826_v33  ;;  %v2069_v34 = vpack.c.bf16 %v2005_v49, %v2001_v38  ;;  %v2833_v31 = vld [vmem:[#allocation4 + $0x3a0] sm:$0xff]  ;;  %v2836_v38 = vld [vmem:[#allocation4 + $0x1b8] sm:$0xff] }
 0x136   :  { %v2072_v32 = vpack.c.bf16 %v2008_v47, %v2004_v41  ;;  %v2003_v36 = vadd.f32 %v1875_v53, %v1747_v45  ;;  %v2007_v61 = vadd.f32 %v1879_v7, %v1751_v40  ;;  %v1740_v57 = vunpack.c.h.bf16 %v2827_v62  ;;  %v2837_v45 = vld [vmem:[#allocation4 + $0x3a8] sm:$0xff]  ;;  %v2838_v40 = vld [vmem:[#allocation4 + $0x3b8] sm:$0xff] }
 0x137   :  { %2091 = vmatprep.subr.bf16.mxu0 %v2070_v44  ;;  %v1994_v0 = vadd.f32 %v1866_v3, %v1738_v8  ;;  %v1998_v60 = vadd.f32 %v1870_v27, %v1742_v11  ;;  %v1744_v58 = vunpack.c.h.bf16 %v2828_v37  ;;  %v1868_v2 = vunpack.c.h.bf16 %v2829_v1  ;;  %v2835_v44 = vld [vmem:[#allocation4 + $0x1a8] sm:$0xff] }
 0x138   :  { %2132 = vmatprep.subr.bf16.mxu1 %v2072_v32  ;;  %2092 = vmatpush2.bf16.msra.mxu0 %v2069_v34  ;;  %v2071_v25 = vpack.c.bf16 %v2007_v61, %v2003_v36  ;;  %v1872_v59 = vunpack.c.h.bf16 %v2830_v26  ;;  %v1737_v14 = vunpack.c.l.bf16 %v2823_v10  ;;  %v1741_v28 = vunpack.c.l.bf16 %v2824_v63 }
 0x139   :  { %v2066_v15 = vpack.c.bf16 %v1998_v60, %v1994_v0  ;;  %v1996_v9 = vadd.f32 %v1868_v2, %v1740_v57  ;;  %v1865_v19 = vunpack.c.l.bf16 %v2825_v12  ;;  %v1869_v29 = vunpack.c.l.bf16 %v2826_v33  ;;  %v2839_v0 = vld [vmem:[#allocation4 + $0x180] sm:$0xff] }
 0x13a   :  { %2133 = vmatpush2.bf16.msra.mxu1 %v2071_v25  ;;  %v2000_v51 = vadd.f32 %v1872_v59, %v1744_v58  ;;  %v1739_v13 = vunpack.c.l.bf16 %v2827_v62  ;;  %v1743_v21 = vunpack.c.l.bf16 %v2828_v37  ;;  %v1867_v52 = vunpack.c.l.bf16 %v2829_v1  ;;  %v2840_v37 = vld [vmem:[#allocation4 + $0x190] sm:$0xff]  ;;  %v2841_v1 = vld [vmem:[#allocation4 + $0x380] sm:$0xff] }
 0x13b   :  { %2093 = vmatprep.subr.bf16.mxu0 %v2066_v15  ;;  %v1993_v22 = vadd.f32 %v1865_v19, %v1737_v14  ;;  %v1997_v23 = vadd.f32 %v1869_v29, %v1741_v28  ;;  %v1871_v54 = vunpack.c.l.bf16 %v2830_v26  ;;  %v1730_v30 = vunpack.c.h.bf16 %v2831_v16  ;;  %v2842_v59 = vld [vmem:[#allocation4 + $0x390] sm:$0xff]  ;;  %v2843_v28 = vld [vmem:[#allocation4 + $0x188] sm:$0xff]  ;;  %v2844_v19 = vld [vmem:[#allocation4 + $0x198] sm:$0xff] }
 0x13c   :  { %v2068_v56 = vpack.c.bf16 %v2000_v51, %v1996_v9  ;;  %v1995_v55 = vadd.f32 %v1867_v52, %v1739_v13  ;;  %v1734_v20 = vunpack.c.h.bf16 %v2832_v18  ;;  %v1858_v35 = vunpack.c.h.bf16 %v2833_v31  ;;  %v2845_v51 = vld [vmem:[#allocation4 + $0x388] sm:$0xff] }
 0x13d   :  { %v2065_v41 = vpack.c.bf16 %v1997_v23, %v1993_v22  ;;  %v1999_v47 = vadd.f32 %v1871_v54, %v1743_v21  ;;  %v1862_v50 = vunpack.c.h.bf16 %v2834_v48  ;;  %v1732_v42 = vunpack.c.h.bf16 %v2835_v44  ;;  %v2846_v21 = vld [vmem:[#allocation4 + $0x398] sm:$0xff] }
 0x13e   :  { %2134 = vmatprep.subr.bf16.mxu1 %v2068_v56  ;;  %v1986_v32 = vadd.f32 %v1858_v35, %v1730_v30  ;;  %v1736_v43 = vunpack.c.h.bf16 %v2836_v38  ;;  %v1860_v39 = vunpack.c.h.bf16 %v2837_v45  ;;  %v1864_v49 = vunpack.c.h.bf16 %v2838_v40 }
 0x13f   :  { %2094 = vmatpush2.bf16.msra.mxu0 %v2065_v41  ;;  %v2067_v46 = vpack.c.bf16 %v1999_v47, %v1995_v55  ;;  %v1990_v53 = vadd.f32 %v1862_v50, %v1734_v20  ;;  %v1729_v4 = vunpack.c.l.bf16 %v2831_v16  ;;  %v1733_v7 = vunpack.c.l.bf16 %v2832_v18 }
 0x140   :  { %v1988_v10 = vadd.f32 %v1860_v39, %v1732_v42  ;;  %v1992_v8 = vadd.f32 %v1864_v49, %v1736_v43  ;;  %v1857_v63 = vunpack.c.l.bf16 %v2833_v31  ;;  %v1861_v11 = vunpack.c.l.bf16 %v2834_v48  ;;  %v2848_v43 = vld [vmem:[#allocation4 + $0x170] sm:$0xff]  ;;  %v2849_v39 = vld [vmem:[#allocation4 + $0x360] sm:$0xff] }
 0x141   :  { %2135 = vmatpush2.bf16.msra.mxu1 %v2067_v46  ;;  %v2062_v12 = vpack.c.bf16 %v1990_v53, %v1986_v32  ;;  %v1731_v3 = vunpack.c.l.bf16 %v2835_v44  ;;  %v1735_v33 = vunpack.c.l.bf16 %v2836_v38  ;;  %v1859_v27 = vunpack.c.l.bf16 %v2837_v45  ;;  %v2847_v32 = vld [vmem:[#allocation4 + $0x160] sm:$0xff]  ;;  %v2850_v53 = vld [vmem:[#allocation4 + $0x370] sm:$0xff] }
 0x142   :  { %v2064_v34 = vpack.c.bf16 %v1992_v8, %v1988_v10  ;;  %v1985_v36 = vadd.f32 %v1857_v63, %v1729_v4  ;;  %v1989_v61 = vadd.f32 %v1861_v11, %v1733_v7  ;;  %v1863_v62 = vunpack.c.l.bf16 %v2838_v40  ;;  %v2851_v7 = vld [vmem:[#allocation4 + $0x168] sm:$0xff]  ;;  %v2852_v63 = vld [vmem:[#allocation4 + $0x178] sm:$0xff] }
 0x143   :  { %2095 = vmatprep.subr.bf16.mxu0 %v2062_v12  ;;  %v1987_v57 = vadd.f32 %v1859_v27, %v1731_v3  ;;  %v1722_v60 = vunpack.c.h.bf16 %v2839_v0  ;;  %v1726_v58 = vunpack.c.h.bf16 %v2840_v37  ;;  %v1850_v2 = vunpack.c.h.bf16 %v2841_v1  ;;  %v2853_v12 = vld [vmem:[#allocation4 + $0x368] sm:$0xff] }
 0x144   :  { %2136 = vmatprep.subr.bf16.mxu1 %v2064_v34  ;;  %v2061_v25 = vpack.c.bf16 %v1989_v61, %v1985_v36  ;;  %v1991_v26 = vadd.f32 %v1863_v62, %v1735_v33  ;;  %v1854_v14 = vunpack.c.h.bf16 %v2842_v59  ;;  %v1724_v15 = vunpack.c.h.bf16 %v2843_v28  ;;  %v2854_v33 = vld [vmem:[#allocation4 + $0x378] sm:$0xff] }
 0x145   :  { %v1978_v9 = vadd.f32 %v1850_v2, %v1722_v60  ;;  %v1728_v29 = vunpack.c.h.bf16 %v2844_v19  ;;  %v1852_v13 = vunpack.c.h.bf16 %v2845_v51  ;;  %v1856_v52 = vunpack.c.h.bf16 %v2846_v21 }
 0x146   :  { %2096 = vmatpush2.bf16.msra.mxu0 %v2061_v25  ;;  %v2063_v22 = vpack.c.bf16 %v1991_v26, %v1987_v57  ;;  %v1982_v23 = vadd.f32 %v1854_v14, %v1726_v58  ;;  %v1721_v54 = vunpack.c.l.bf16 %v2839_v0  ;;  %v1725_v16 = vunpack.c.l.bf16 %v2840_v37 }
 0x147   :  { %v1980_v30 = vadd.f32 %v1852_v13, %v1724_v15  ;;  %v1984_v56 = vadd.f32 %v1856_v52, %v1728_v29  ;;  %v1849_v55 = vunpack.c.l.bf16 %v2841_v1  ;;  %v1853_v18 = vunpack.c.l.bf16 %v2842_v59  ;;  %v2856_v29 = vld [vmem:[#allocation4 + $0x150] sm:$0xff]  ;;  %v2857_v13 = vld [vmem:[#allocation4 + $0x340] sm:$0xff] }
 0x148   :  { %2137 = vmatpush2.bf16.msra.mxu1 %v2063_v22  ;;  %v2058_v20 = vpack.c.bf16 %v1982_v23, %v1978_v9  ;;  %v1723_v31 = vunpack.c.l.bf16 %v2843_v28  ;;  %v1727_v35 = vunpack.c.l.bf16 %v2844_v19  ;;  %v1851_v41 = vunpack.c.l.bf16 %v2845_v51  ;;  %v2855_v9 = vld [vmem:[#allocation4 + $0x140] sm:$0xff]  ;;  %v2858_v23 = vld [vmem:[#allocation4 + $0x350] sm:$0xff] }
 0x149   :  { %v2060_v47 = vpack.c.bf16 %v1984_v56, %v1980_v30  ;;  %v1977_v48 = vadd.f32 %v1849_v55, %v1721_v54  ;;  %v1981_v50 = vadd.f32 %v1853_v18, %v1725_v16  ;;  %v1855_v44 = vunpack.c.l.bf16 %v2846_v21  ;;  %v2859_v16 = vld [vmem:[#allocation4 + $0x148] sm:$0xff]  ;;  %v2860_v55 = vld [vmem:[#allocation4 + $0x158] sm:$0xff] }
 0x14a   :  { %2097 = vmatprep.subr.bf16.mxu0 %v2058_v20  ;;  %v1979_v42 = vadd.f32 %v1851_v41, %v1723_v31  ;;  %v1714_v38 = vunpack.c.h.bf16 %v2847_v32  ;;  %v1718_v45 = vunpack.c.h.bf16 %v2848_v43  ;;  %v1842_v40 = vunpack.c.h.bf16 %v2849_v39  ;;  %v2861_v20 = vld [vmem:[#allocation4 + $0x348] sm:$0xff] }
 0x14b   :  { %2138 = vmatprep.subr.bf16.mxu1 %v2060_v47  ;;  %v2057_v49 = vpack.c.bf16 %v1981_v50, %v1977_v48  ;;  %v1983_v46 = vadd.f32 %v1855_v44, %v1727_v35  ;;  %v1846_v4 = vunpack.c.h.bf16 %v2850_v53  ;;  %v1716_v10 = vunpack.c.h.bf16 %v2851_v7  ;;  %v2862_v35 = vld [vmem:[#allocation4 + $0x358] sm:$0xff] }
 0x14c   :  { %v1970_v8 = vadd.f32 %v1842_v40, %v1714_v38  ;;  %v1720_v11 = vunpack.c.h.bf16 %v2852_v63  ;;  %v1844_v3 = vunpack.c.h.bf16 %v2853_v12  ;;  %v1848_v27 = vunpack.c.h.bf16 %v2854_v33 }
 0x14d   :  { %2098 = vmatpush2.bf16.msra.mxu0 %v2057_v49  ;;  %v2059_v34 = vpack.c.bf16 %v1983_v46, %v1979_v42  ;;  %v1974_v36 = vadd.f32 %v1846_v4, %v1718_v45  ;;  %v1713_v61 = vunpack.c.l.bf16 %v2847_v32  ;;  %v1717_v62 = vunpack.c.l.bf16 %v2848_v43 }
 0x14e   :  { %v1972_v57 = vadd.f32 %v1844_v3, %v1716_v10  ;;  %v1976_v0 = vadd.f32 %v1848_v27, %v1720_v11  ;;  %v1841_v60 = vunpack.c.l.bf16 %v2849_v39  ;;  %v1845_v37 = vunpack.c.l.bf16 %v2850_v53  ;;  %v2864_v11 = vld [vmem:[#allocation4 + $0x130] sm:$0xff]  ;;  %v2865_v3 = vld [vmem:[#allocation4 + $0x320] sm:$0xff] }
 0x14f   :  { %2139 = vmatpush2.bf16.msra.mxu1 %v2059_v34  ;;  %v2054_v58 = vpack.c.bf16 %v1974_v36, %v1970_v8  ;;  %v1715_v1 = vunpack.c.l.bf16 %v2851_v7  ;;  %v1719_v2 = vunpack.c.l.bf16 %v2852_v63  ;;  %v1843_v25 = vunpack.c.l.bf16 %v2853_v12  ;;  %v2863_v8 = vld [vmem:[#allocation4 + $0x120] sm:$0xff]  ;;  %v2866_v36 = vld [vmem:[#allocation4 + $0x330] sm:$0xff] }
 0x150   :  { %v2056_v26 = vpack.c.bf16 %v1976_v0, %v1972_v57  ;;  %v1969_v59 = vadd.f32 %v1841_v60, %v1713_v61  ;;  %v1973_v14 = vadd.f32 %v1845_v37, %v1717_v62  ;;  %v1847_v28 = vunpack.c.l.bf16 %v2854_v33  ;;  %v2867_v62 = vld [vmem:[#allocation4 + $0x128] sm:$0xff]  ;;  %v2868_v60 = vld [vmem:[#allocation4 + $0x138] sm:$0xff] }
 0x151   :  { %2099 = vmatprep.subr.bf16.mxu0 %v2054_v58  ;;  %v1971_v15 = vadd.f32 %v1843_v25, %v1715_v1  ;;  %v1706_v19 = vunpack.c.h.bf16 %v2855_v9  ;;  %v1710_v51 = vunpack.c.h.bf16 %v2856_v29  ;;  %v1834_v21 = vunpack.c.h.bf16 %v2857_v13  ;;  %v2869_v58 = vld [vmem:[#allocation4 + $0x328] sm:$0xff] }
 0x152   :  { %2140 = vmatprep.subr.bf16.mxu1 %v2056_v26  ;;  %v2053_v52 = vpack.c.bf16 %v1973_v14, %v1969_v59  ;;  %v1975_v22 = vadd.f32 %v1847_v28, %v1719_v2  ;;  %v1838_v54 = vunpack.c.h.bf16 %v2858_v23  ;;  %v1708_v30 = vunpack.c.h.bf16 %v2859_v16  ;;  %v2870_v2 = vld [vmem:[#allocation4 + $0x338] sm:$0xff] }
 0x153   :  { %v1962_v56 = vadd.f32 %v1834_v21, %v1706_v19  ;;  %v1712_v18 = vunpack.c.h.bf16 %v2860_v55  ;;  %v1836_v31 = vunpack.c.h.bf16 %v2861_v20  ;;  %v1840_v41 = vunpack.c.h.bf16 %v2862_v35 }
 0x154   :  { %2100 = vmatpush2.bf16.msra.mxu0 %v2053_v52  ;;  %v2055_v47 = vpack.c.bf16 %v1975_v22, %v1971_v15  ;;  %v1966_v48 = vadd.f32 %v1838_v54, %v1710_v51  ;;  %v1705_v50 = vunpack.c.l.bf16 %v2855_v9  ;;  %v1709_v44 = vunpack.c.l.bf16 %v2856_v29 }
 0x155   :  { %v1964_v42 = vadd.f32 %v1836_v31, %v1708_v30  ;;  %v1968_v32 = vadd.f32 %v1840_v41, %v1712_v18  ;;  %v1833_v38 = vunpack.c.l.bf16 %v2857_v13  ;;  %v1837_v43 = vunpack.c.l.bf16 %v2858_v23  ;;  %v2871_v31 = vld [vmem:[#allocation4 + $0x100] sm:$0xff] }
 0x156   :  { %2141 = vmatpush2.bf16.msra.mxu1 %v2055_v47  ;;  %v2050_v45 = vpack.c.bf16 %v1966_v48, %v1962_v56  ;;  %v1707_v39 = vunpack.c.l.bf16 %v2859_v16  ;;  %v1711_v40 = vunpack.c.l.bf16 %v2860_v55  ;;  %v1835_v49 = vunpack.c.l.bf16 %v2861_v20  ;;  %v2872_v47 = vld [vmem:[#allocation4 + $0x110] sm:$0xff] }
 0x157   :  { %v2052_v46 = vpack.c.bf16 %v1968_v32, %v1964_v42  ;;  %v1961_v53 = vadd.f32 %v1833_v38, %v1705_v50  ;;  %v1965_v4 = vadd.f32 %v1837_v43, %v1709_v44  ;;  %v1839_v7 = vunpack.c.l.bf16 %v2862_v35  ;;  %v2873_v50 = vld [vmem:[#allocation4 + $0x300] sm:$0xff] }
 0x158   :  { %2101 = vmatprep.subr.bf16.mxu0 %v2050_v45  ;;  %v1963_v10 = vadd.f32 %v1835_v49, %v1707_v39  ;;  %v1698_v63 = vunpack.c.h.bf16 %v2863_v8  ;;  %v1702_v12 = vunpack.c.h.bf16 %v2864_v11  ;;  %v1826_v33 = vunpack.c.h.bf16 %v2865_v3  ;;  %v2874_v45 = vld [vmem:[#allocation4 + $0x310] sm:$0xff] }
 0x159   :  { %2142 = vmatprep.subr.bf16.mxu1 %v2052_v46  ;;  %v2049_v27 = vpack.c.bf16 %v1965_v4, %v1961_v53  ;;  %v1967_v34 = vadd.f32 %v1839_v7, %v1711_v40  ;;  %v1830_v61 = vunpack.c.h.bf16 %v2866_v36  ;;  %v1700_v57 = vunpack.c.h.bf16 %v2867_v62  ;;  %v2875_v46 = vld [vmem:[#allocation4 + $0x108] sm:$0xff] }
 0x15a   :  { %v1954_v0 = vadd.f32 %v1826_v33, %v1698_v63  ;;  %v1704_v37 = vunpack.c.h.bf16 %v2868_v60  ;;  %v1828_v1 = vunpack.c.h.bf16 %v2869_v58  ;;  %v1832_v25 = vunpack.c.h.bf16 %v2870_v2  ;;  %v2877_v63 = vld [vmem:[#allocation4 + $0x308] sm:$0xff] }
 0x15b   :  { %2102 = vmatpush2.bf16.msra.mxu0 %v2049_v27  ;;  %v2051_v59 = vpack.c.bf16 %v1967_v34, %v1963_v10  ;;  %v1958_v14 = vadd.f32 %v1830_v61, %v1702_v12  ;;  %v1697_v28 = vunpack.c.l.bf16 %v2863_v8  ;;  %v1701_v15 = vunpack.c.l.bf16 %v2864_v11  ;;  %v2876_v10 = vld [vmem:[#allocation4 + $0x118] sm:$0xff] }
 0x15c   :  { %v1956_v19 = vadd.f32 %v1828_v1, %v1700_v57  ;;  %v1960_v29 = vadd.f32 %v1832_v25, %v1704_v37  ;;  %v1825_v51 = vunpack.c.l.bf16 %v2865_v3  ;;  %v1829_v52 = vunpack.c.l.bf16 %v2866_v36  ;;  %v2878_v12 = vld [vmem:[#allocation4 + $0x318] sm:$0xff] }
 0x15d   :  { %2143 = vmatpush2.bf16.msra.mxu1 %v2051_v59  ;;  %v2046_v21 = vpack.c.bf16 %v1958_v14, %v1954_v0  ;;  %v1699_v22 = vunpack.c.l.bf16 %v2867_v62  ;;  %v1703_v23 = vunpack.c.l.bf16 %v2868_v60  ;;  %v1827_v18 = vunpack.c.l.bf16 %v2869_v58 }
 0x15e   :  { %v2048_v16 = vpack.c.bf16 %v1960_v29, %v1956_v19  ;;  %v1953_v30 = vadd.f32 %v1825_v51, %v1697_v28  ;;  %v1957_v55 = vadd.f32 %v1829_v52, %v1701_v15  ;;  %v1831_v20 = vunpack.c.l.bf16 %v2870_v2  ;;  %v2879_v19 = vld [vmem:[#allocation6 + $0x74] ss:$8 sps:$4 sm:$0xff]   ;;  %v3473_v52 = vld [vmem:[#allocation11_spill] sm:$0xff] }
 0x15f   :  { %2103 = vmatprep.subr.bf16.mxu0 %v2046_v21  ;;  %v1690_v35 = vunpack.c.h.bf16 %v2871_v31  ;;  %v1694_v48 = vunpack.c.h.bf16 %v2872_v47  ;;  %v1818_v44 = vunpack.c.h.bf16 %v2873_v50  ;;  %v1955_v38 = vadd.f32 %v1827_v18, %v1699_v22  ;;  %v2880_v29 = vld [vmem:[#allocation8 + $0x74] ss:$8 sps:$4 sm:$0xff]  }
 0x160   :  { %2144 = vmatprep.subr.bf16.mxu1 %v2048_v16  ;;  %v2045_v32 = vpack.c.bf16 %v1957_v55, %v1953_v30  ;;  %v1959_v43 = vadd.f32 %v1831_v20, %v1703_v23  ;;  %v1822_v39 = vunpack.c.h.bf16 %v2874_v45  ;;  %v1692_v53 = vunpack.c.h.bf16 %v2875_v46  ;;  %v2881_v30 = vld [vmem:[%s3452_s5] sm:$0xf] }
 0x161   :  { %v1946_v49 = vadd.f32 %v1818_v44, %v1690_v35  ;;  %v1696_v8 = vunpack.c.h.bf16 %v2876_v10  ;;  %v1820_v11 = vunpack.c.h.bf16 %v2877_v63  ;;  %v1824_v3 = vunpack.c.h.bf16 %v2878_v12  ;;  %v3474_v44 = vld [vmem:[#allocation13_spill] sm:$0xff] }
 0x162   :  { %2104 = vmatpush2.bf16.msra.mxu0 %v2045_v32  ;;  %v2047_v4 = vpack.c.bf16 %v1959_v43, %v1955_v38  ;;  %v1950_v7 = vadd.f32 %v1822_v39, %v1694_v48  ;;  %v1689_v33 = vunpack.c.l.bf16 %v2871_v31  ;;  %v1693_v27 = vunpack.c.l.bf16 %v2872_v47  ;;  %v282_v48 = vld [vmem:[%s3453_s6] sm:$0x3] }
 0x163   :  { %v1948_v36 = vadd.f32 %v1820_v11, %v1692_v53  ;;  %v1817_v61 = vunpack.c.l.bf16 %v2873_v50  ;;  %v1821_v62 = vunpack.c.l.bf16 %v2874_v45  ;;  %v1952_v57 = vadd.f32 %v1824_v3, %v1696_v8  ;;  %v283_v50 = vld [vmem:[%s3454_s7] sm:$0x3] }
 0x164   :  { %2145 = vmatpush2.bf16.msra.mxu1 %v2047_v4  ;;  %v2042_v34 = vpack.c.bf16 %v1950_v7, %v1946_v49  ;;  %v1691_v0 = vunpack.c.l.bf16 %v2875_v46  ;;  %v1695_v60 = vunpack.c.l.bf16 %v2876_v10  ;;  %v1819_v37 = vunpack.c.l.bf16 %v2877_v63 }
 0x165   :  { %v1945_v58 = vadd.f32 %v1817_v61, %v1689_v33  ;;  %v1949_v1 = vadd.f32 %v1821_v62, %v1693_v27  ;;  %v1823_v2 = vunpack.c.l.bf16 %v2878_v12  ;;  %v2044_v25 = vpack.c.bf16 %v1952_v57, %v1948_v36 }
 0x166   :  { %2105 = vmatprep.subr.bf16.mxu0 %v2042_v34  ;;  %v1947_v59 = vadd.f32 %v1819_v37, %v1691_v0  ;;  %v2503_v51 = vmul.f32 -1.442695, %v3335_v24  ;;  %v2504_v21 = vmul.f32 -1.442695, %v3341_v17  ;;  %v963_v22 = vsub.s32 2, %v3473_v52 }
 0x167   :  { %v2041_v14 = vpack.c.bf16 %v1949_v1, %v1945_v58  ;;  %v1951_v28 = vadd.f32 %v1823_v2, %v1695_v60  ;;  %2146 = vmatprep.subr.bf16.mxu1 %v2044_v25  ;;  %v967_v23 = vsub.s32 3, %v3473_v52  ;;  %v3016_v61 = vmov 1966171168  }
 0x168   :  { %2743 = vpow2.f32 %v2503_v51  ;;  %v1595_v62 = vunpack.c.l.s4 %v3016_v61  ;;  %v2916_v61 = vld [vmem:[#allocation8 + $0xf0] ss:$8 sps:$4 sm:$0xff]  }
 0x169   :  { %2106 = vmatpush2.bf16.msra.mxu0 %v2041_v14  ;;  %v2043_v15 = vpack.c.bf16 %v1951_v28, %v1947_v59  ;;  %2745 = vpow2.f32 %v2504_v21  ;;  %v3377_v55 = vrot.slane %v2881_v30, %v967_v23  ;;  %v2882_v14 = vld [vmem:[%s3455_s8] sm:$0x3] }
 0x16a   :  { %v3360_v26 = vpop.f32.mrf.mxu0  ;;  %2157 = vmatprep.subr.bf16.mxu0 %v2879_v19  ;;  %v1596_v60 = vunpack.c.0.s8 %v1595_v62  ;;  %v2917_v62 = vld [vmem:[#allocation6 + $0xe4] ss:$8 sps:$4 sm:$0xff]  }
 0x16b   :  { %v3362_v9 = vpop.f32.mrf.mxu1  ;;  %2147 = vmatpush2.bf16.msra.mxu1 %v2043_v15 }
 0x16c   :  { %v3364_v13 = vpop.f32.mrf.mxu0  ;;  %2198 = vmatprep.subr.bf16.mxu1 %v2880_v29  ;;  %v3408_v58 = vsub.s32 %v1596_v60, %v3473_v52  ;;  %v2920_v60 = vld [vmem:[#allocation8 + $0xe0] ss:$8 sps:$4 sm:$0xff]  }
 0x16d   :  { %v3366_v54 = vpop.f32.mrf.mxu1  ;;  %v1092_v31 = vadd.f32 %v3364_v13, %v3377_v55  ;;  %v3395_v13 = vrot.slane %v283_v50, %v3474_v44 }
 0x16e   :  { %v1093_v56 = vpop.f32.mrf.mxu0 }
 0x16f   :  { %v1134_v41 = vpop.f32.mrf.mxu1  ;;  %v3375_v56 = vrot.slane %v2881_v30, %v963_v22 }
 0x170   :  { %v1094_v42 = vpop.f32.mrf.mxu0  ;;  %v1133_v41 = vadd.f32 %v3366_v54, %v1092_v31  ;;  %v3475_v54 = vld [vmem:[#allocation12_spill] sm:$0xff] }
 0x171   :  { %v1135_v40 = vpop.f32.mrf.mxu1  ;;  %v1090_v24 = vadd.f32 %v3360_v26, %v3375_v56  ;;  %v3392_v42 = vrot.slane %v282_v48, %v3474_v44  ;;  %v3398_v32 = vrot.slane %v283_v50, %v3475_v54  ;;  %v3403_v39 = vrot.slane %v282_v48, %v3475_v54  ;;  %v2887_v31 = vld [vmem:[#allocation6 + $0x60] ss:$8 sps:$4 sm:$0xff]   ;;  %v2891_v48 = vld [vmem:[#allocation6 + $0x50] ss:$8 sps:$4 sm:$0xff]  }
 0x172   :  { %v2506_v26 = vmul.f32 -1.442695, %v1133_v41  ;;  %v2889_v41 = vld [vmem:[#allocation6 + $0x54] ss:$8 sps:$4 sm:$0xff]   ;;  %v2892_v50 = vld [vmem:[#allocation8 + $0x50] ss:$8 sps:$4 sm:$0xff]  }
 0x173   :  { %v1131_v35 = vadd.f32 %v3362_v9, %v1090_v24  ;;  %v2885_v24 = vld [vmem:[#allocation6 + $0x64] ss:$8 sps:$4 sm:$0xff]  }
 0x175   :  { %v2744_v16 = vpop.eup %2743  ;;  %v2505_v47 = vmul.f32 -1.442695, %v1131_v35  ;;  %v2888_v35 = vld [vmem:[#allocation8 + $0x60] ss:$8 sps:$4 sm:$0xff]  }
 0x176   :  { %v2746_v18 = vpop.eup %2745  ;;  %v1567_v20 = vadd.f32 1.0, %v2744_v16 }
 0x177   :  { %v1568_v17 = vadd.f32 1.0, %v2746_v18  ;;  %v2883_v18 = vld [vmem:[#allocation6 + $0x70] ss:$8 sps:$4 sm:$0xff]  }
 0x178   :  { %2747 = vrcp.f32 %v1567_v20  ;;  %v2884_v20 = vld [vmem:[#allocation8 + $0x70] ss:$8 sps:$4 sm:$0xff]  }
 0x179   :  { %2749 = vrcp.f32 %v1568_v17  ;;  %v2886_v17 = vld [vmem:[#allocation8 + $0x64] ss:$8 sps:$4 sm:$0xff]  }
 0x17a   :  { %2751 = vpow2.f32 %v2505_v47  ;;  %v2890_v47 = vld [vmem:[#allocation8 + $0x54] ss:$8 sps:$4 sm:$0xff]  }
 0x17b   :  { %2753 = vpow2.f32 %v2506_v26  ;;  %v2893_v26 = vld [vmem:[#allocation6 + $0x44] ss:$8 sps:$4 sm:$0xff]  }
 0x185   :  { %v2748_v49 = vpop.eup %2747 }
 0x186   :  { %v2750_v10 = vpop.eup %2749 }
 0x187   :  { %v2752_v34 = vpop.eup %2751 }
 0x188   :  { %v2754_v36 = vpop.eup %2753  ;;  %v1579_v57 = vadd.f32 1.0, %v2752_v34  ;;  %v2914_v34 = vld [vmem:[#allocation8 + $0xf4] ss:$8 sps:$4 sm:$0xff]  }
 0x189   :  { %v1580_v0 = vadd.f32 1.0, %v2754_v36  ;;  %v2915_v36 = vld [vmem:[#allocation6 + $0xf0] ss:$8 sps:$4 sm:$0xff]  }
 0x1aa   :  { %v1342_v9 = vpop.f32.mrf.mxu0 }
 0x1ab   :  { %v1554_v38 = vpop.f32.mrf.mxu1  ;;  %v1343_v43 = vadd.f32 %v1342_v9, %v3392_v42  ;;  %v2895_v9 = vld [vmem:[#allocation6 + $0x40] ss:$8 sps:$4 sm:$0xff]  }
 0x1ac   :  { %v1555_v45 = vadd.f32 %v1554_v38, %v3395_v13  ;;  %v1344_v40 = vpop.f32.mrf.mxu0  ;;  %v2897_v38 = vld [vmem:[#allocation6 + $0x34] ss:$8 sps:$4 sm:$0xff]  }
 0x1ad   :  { %v1556_v46 = vpop.f32.mrf.mxu1  ;;  %v1345_v11 = vadd.f32 %v1344_v40, %v3403_v39  ;;  %v2900_v40 = vld [vmem:[#allocation8 + $0x30] ss:$8 sps:$4 sm:$0xff]  }
 0x1ae   :  { %v1585_v53 = vmul.f32 %v2748_v49, %v1555_v45  ;;  %v1557_v4 = vadd.f32 %v1556_v46, %v3398_v32  ;;  %v1346_v7 = vpop.f32.mrf.mxu0  ;;  %v2899_v45 = vld [vmem:[#allocation6 + $0x30] ss:$8 sps:$4 sm:$0xff]   ;;  %v2901_v49 = vld [vmem:[#allocation6 + $0x24] ss:$8 sps:$4 sm:$0xff]  }
 0x1af   :  { %v1558_v8 = vpop.f32.mrf.mxu1  ;;  %v2902_v46 = vld [vmem:[#allocation8 + $0x24] ss:$8 sps:$4 sm:$0xff]   ;;  %v2905_v7 = vld [vmem:[#allocation6 + $0x14] ss:$8 sps:$4 sm:$0xff]  }
 0x1b0   :  { %v1587_v63 = vadd.f32 %v1585_v53, %v1343_v43  ;;  %v1586_v12 = vmul.f32 %v2750_v10, %v1557_v4  ;;  %v1347_v3 = vpop.f32.mrf.mxu0  ;;  %v2898_v43 = vld [vmem:[#allocation8 + $0x34] ss:$8 sps:$4 sm:$0xff]   ;;  %v2903_v53 = vld [vmem:[#allocation6 + $0x20] ss:$8 sps:$4 sm:$0xff]   ;;  %v2907_v8 = vld [vmem:[#allocation6 + $0x10] ss:$8 sps:$4 sm:$0xff]  }
 0x1b1   :  { %v1559_v33 = vpop.f32.mrf.mxu1  ;;  %v2904_v4 = vld [vmem:[#allocation8 + $0x20] ss:$8 sps:$4 sm:$0xff]   ;;  %v2906_v10 = vld [vmem:[#allocation8 + $0x14] ss:$8 sps:$4 sm:$0xff]  }
 0x1b2   :  { %v1588_v27 = vadd.f32 %v1586_v12, %v1345_v11  ;;  %2755 = vtanh.f32 %v1587_v63  ;;  %v2908_v63 = vld [vmem:[#allocation8 + $0x10] ss:$8 sps:$4 sm:$0xff]   ;;  %v2909_v11 = vld [vmem:[#allocation6 + $0x4] ss:$8 sps:$4 sm:$0xff]   ;;  %v2911_v3 = vld [vmem:[#allocation6] ss:$8 sps:$4 sm:$0xff]  }
 0x1b3   :  { %v2910_v12 = vld [vmem:[#allocation8 + $0x4] ss:$8 sps:$4 sm:$0xff]   ;;  %v2912_v33 = vld [vmem:[#allocation8] ss:$8 sps:$4 sm:$0xff]  }
 0x1b4   :  { %2757 = vtanh.f32 %v1588_v27  ;;  %v2913_v27 = vld [vmem:[#allocation6 + $0xf4] ss:$8 sps:$4 sm:$0xff]  }
 0x1b5   :  { %2759 = vrcp.f32 %v1579_v57  ;;  %v2918_v57 = vld [vmem:[#allocation8 + $0xe4] ss:$8 sps:$4 sm:$0xff]  }
 0x1b6   :  { %2761 = vrcp.f32 %v1580_v0  ;;  %v2919_v0 = vld [vmem:[#allocation6 + $0xe0] ss:$8 sps:$4 sm:$0xff]  }
 0x1bf   :  { %v2756_v37 = vpop.eup %2755 }
 0x1c1   :  { %v2758_v1 = vpop.eup %2757 }
 0x1c2   :  { %v1593_v2 = vcombine.low %v2756_v37, %v2758_v1  ;;  %v2760_v15 = vpop.eup %2759 }
 0x1c3   :  { %v2762_v51 = vpop.eup %2761 }
 0x1c4   :  { %v1600_v25 = vrot.slane %v1593_v2, %v3408_v58  ;;  %v2923_v2 = vld [vmem:[#allocation6 + $0xd0] ss:$8 sps:$4 sm:$0xff]  }
 0x1c6   :  { %v1607_v59 = vrot.slane %v1600_v25, %v3408_v58  ;;  %v2924_v25 = vld [vmem:[#allocation8 + $0xd0] ss:$8 sps:$4 sm:$0xff]  }
 0x1c8   :  { %v1609_v28 = vsub.f32 %v2882_v14, %v1607_v59  ;;  %v2925_v59 = vld [vmem:[#allocation6 + $0xc4] ss:$8 sps:$4 sm:$0xff]  }
 0x1c9   :  { %v2926_v14 = vld [vmem:[#allocation8 + $0xc4] ss:$8 sps:$4 sm:$0xff]  }
 0x1ca   :  { %v1618_v19 = vrot.slane %v1609_v28, %v3475_v54  ;;  %v1614_v29 = vrot.slane %v1609_v28, %v3474_v44  ;;  %v2894_v44 = vld [vmem:[#allocation8 + $0x44] ss:$8 sps:$4 sm:$0xff]   ;;  %v2896_v54 = vld [vmem:[#allocation8 + $0x40] ss:$8 sps:$4 sm:$0xff]  }
 0x1cb   :  { %v2927_v28 = vld [vmem:[#allocation6 + $0xc0] ss:$8 sps:$4 sm:$0xff]  }
 0x1cc   :  { %v1622_v21 = vmul.f32 %v2762_v51, %v1618_v19  ;;  %v1621_v52 = vmul.f32 %v2760_v15, %v1614_v29  ;;  %v2928_v15 = vld [vmem:[#allocation8 + $0xc0] ss:$8 sps:$4 sm:$0xff]   ;;  %v2929_v19 = vld [vmem:[#allocation6 + $0xb4] ss:$8 sps:$4 sm:$0xff]   ;;  %v2931_v51 = vld [vmem:[#allocation6 + $0xb0] ss:$8 sps:$4 sm:$0xff]  }
 0x1cd   :  { %v2930_v29 = vld [vmem:[#allocation8 + $0xb4] ss:$8 sps:$4 sm:$0xff]  }
 0x1ce   :  { %v3417_v22 = vadd.f32 %v2758_v1, %v1622_v21  ;;  %v3419_v23 = vadd.f32 %v2756_v37, %v1621_v52  ;;  %v2921_v37 = vld [vmem:[#allocation6 + $0xd4] ss:$8 sps:$4 sm:$0xff]   ;;  %v2932_v21 = vld [vmem:[#allocation8 + $0xb0] ss:$8 sps:$4 sm:$0xff]   ;;  %v2933_v52 = vld [vmem:[#allocation6 + $0xa4] ss:$8 sps:$4 sm:$0xff]  }
 0x1cf   :  { %v2922_v1 = vld [vmem:[#allocation8 + $0xd4] ss:$8 sps:$4 sm:$0xff]  }
 0x1d0   :  { %v2074_v16 = vpack.c.bf16 %v3417_v22, %v3417_v22  ;;  %v3425_v30 = vpack.c.bf16 %v3419_v23, %v3419_v23 }
 0x1d2   :  { %2107 = vmatprep.mubr.bf16.mxu0 %v2074_v16  ;;  %2148 = vmatprep.mubr.bf16.mxu1 %v2074_v16 }
 0x1d3   :  { %2108 = vmatmul.mubr.bf16.vlgmr.msra.gmra.mxu0 %v3425_v30  ;;  %2149 = vmatmul.mubr.bf16.vlgmr.msra.gmra.mxu1 %v3425_v30 }
 0x1d4   :  { %2158 = vmatpush1.bf16.msra.mxu0 %v2883_v18  ;;  %2199 = vmatpush1.bf16.msra.mxu1 %v2884_v20  ;;  %v2935_v18 = vld [vmem:[#allocation6 + $0xa0] ss:$8 sps:$4 sm:$0xff]  }
 0x1d5   :  { %2189 = vmatprep.mubr.bf16.mxu0 %v2074_v16  ;;  %2230 = vmatprep.mubr.bf16.mxu1 %v2074_v16  ;;  %v2934_v16 = vld [vmem:[#allocation8 + $0xa4] ss:$8 sps:$4 sm:$0xff]   ;;  %v2936_v20 = vld [vmem:[#allocation8 + $0xa0] ss:$8 sps:$4 sm:$0xff]  }
 0x1d6   :  { %2159 = vmatprep.subr.bf16.mxu0 %v2885_v24  ;;  %2200 = vmatprep.subr.bf16.mxu1 %v2886_v17  ;;  %v2937_v24 = vld [vmem:[#allocation6 + $0x94] ss:$8 sps:$4 sm:$0xff]  }
 0x1d7   :  { %v2938_v17 = vld [vmem:[#allocation8 + $0x94] ss:$8 sps:$4 sm:$0xff]  }
 0x1d8   :  { %2160 = vmatpush1.bf16.msra.mxu0 %v2887_v31  ;;  %2201 = vmatpush1.bf16.msra.mxu1 %v2888_v35  ;;  %v2939_v31 = vld [vmem:[#allocation6 + $0x90] ss:$8 sps:$4 sm:$0xff]  }
 0x1d9   :  { %2161 = vmatprep.subr.bf16.mxu0 %v2889_v41  ;;  %2202 = vmatprep.subr.bf16.mxu1 %v2890_v47  ;;  %v2940_v35 = vld [vmem:[#allocation8 + $0x90] ss:$8 sps:$4 sm:$0xff]   ;;  %v2941_v41 = vld [vmem:[#allocation6 + $0x84] ss:$8 sps:$4 sm:$0xff]  }
 0x1da   :  { %v2942_v47 = vld [vmem:[#allocation8 + $0x84] ss:$8 sps:$4 sm:$0xff]  }
 0x1dc   :  { %2162 = vmatpush1.bf16.msra.mxu0 %v2891_v48  ;;  %2203 = vmatpush1.bf16.msra.mxu1 %v2892_v50  ;;  %v2943_v48 = vld [vmem:[#allocation6 + $0x80] ss:$8 sps:$4 sm:$0xff]  }
 0x1dd   :  { %2163 = vmatprep.subr.bf16.mxu0 %v2893_v26  ;;  %2204 = vmatprep.subr.bf16.mxu1 %v2894_v44  ;;  %v2944_v50 = vld [vmem:[#allocation8 + $0x80] ss:$8 sps:$4 sm:$0xff]  }
 0x1e0   :  { %2164 = vmatpush1.bf16.msra.mxu0 %v2895_v9  ;;  %2205 = vmatpush1.bf16.msra.mxu1 %v2896_v54 }
 0x1e1   :  { %2165 = vmatprep.subr.bf16.mxu0 %v2897_v38  ;;  %2206 = vmatprep.subr.bf16.mxu1 %v2898_v43 }
 0x1e4   :  { %2166 = vmatpush1.bf16.msra.mxu0 %v2899_v45  ;;  %2207 = vmatpush1.bf16.msra.mxu1 %v2900_v40 }
 0x1e5   :  { %2167 = vmatprep.subr.bf16.mxu0 %v2901_v49  ;;  %2208 = vmatprep.subr.bf16.mxu1 %v2902_v46 }
 0x1e8   :  { %2168 = vmatpush1.bf16.msra.mxu0 %v2903_v53  ;;  %2209 = vmatpush1.bf16.msra.mxu1 %v2904_v4 }
 0x1e9   :  { %2169 = vmatprep.subr.bf16.mxu0 %v2905_v7  ;;  %2210 = vmatprep.subr.bf16.mxu1 %v2906_v10 }
 0x1ec   :  { %2170 = vmatpush1.bf16.msra.mxu0 %v2907_v8  ;;  %2211 = vmatpush1.bf16.msra.mxu1 %v2908_v63 }
 0x1ed   :  { %2171 = vmatprep.subr.bf16.mxu0 %v2909_v11  ;;  %2212 = vmatprep.subr.bf16.mxu1 %v2910_v12 }
 0x1f0   :  { %2172 = vmatpush1.bf16.msra.mxu0 %v2911_v3  ;;  %2213 = vmatpush1.bf16.msra.mxu1 %v2912_v33 }
 0x1f1   :  { %2173 = vmatprep.subr.bf16.mxu0 %v2913_v27  ;;  %2214 = vmatprep.subr.bf16.mxu1 %v2914_v34 }
 0x1f4   :  { %2174 = vmatpush2.bf16.msra.mxu0 %v2915_v36  ;;  %2215 = vmatpush2.bf16.msra.mxu1 %v2916_v61 }
 0x1f5   :  { %2175 = vmatprep.subr.bf16.mxu0 %v2917_v62  ;;  %2216 = vmatprep.subr.bf16.mxu1 %v2918_v57 }
 0x1f8   :  { %2176 = vmatpush2.bf16.msra.mxu0 %v2919_v0  ;;  %2217 = vmatpush2.bf16.msra.mxu1 %v2920_v60 }
 0x1f9   :  { %2177 = vmatprep.subr.bf16.mxu0 %v2921_v37  ;;  %2218 = vmatprep.subr.bf16.mxu1 %v2922_v1 }
 0x1fc   :  { %2178 = vmatpush2.bf16.msra.mxu0 %v2923_v2  ;;  %2219 = vmatpush2.bf16.msra.mxu1 %v2924_v25 }
 0x1fd   :  { %2179 = vmatprep.subr.bf16.mxu0 %v2925_v59  ;;  %2220 = vmatprep.subr.bf16.mxu1 %v2926_v14 }
 0x200   :  { %2180 = vmatpush2.bf16.msra.mxu0 %v2927_v28  ;;  %2221 = vmatpush2.bf16.msra.mxu1 %v2928_v15 }
 0x201   :  { %2181 = vmatprep.subr.bf16.mxu0 %v2929_v19  ;;  %2222 = vmatprep.subr.bf16.mxu1 %v2930_v29 }
 0x204   :  { %2182 = vmatpush2.bf16.msra.mxu0 %v2931_v51  ;;  %2223 = vmatpush2.bf16.msra.mxu1 %v2932_v21 }
 0x205   :  { %2183 = vmatprep.subr.bf16.mxu0 %v2933_v52  ;;  %2224 = vmatprep.subr.bf16.mxu1 %v2934_v16 }
 0x208   :  { %2184 = vmatpush2.bf16.msra.mxu0 %v2935_v18  ;;  %2225 = vmatpush2.bf16.msra.mxu1 %v2936_v20 }
 0x209   :  { %2185 = vmatprep.subr.bf16.mxu0 %v2937_v24  ;;  %2226 = vmatprep.subr.bf16.mxu1 %v2938_v17  ;;  %v3476_v17 = vlaneseq }
 0x20b   :  { %vm2295_vm0 = vcmp.lt.s32.totalorder %v3476_v17, 256 }
 0x20c   :  { %2186 = vmatpush2.bf16.msra.mxu0 %v2939_v31  ;;  %2227 = vmatpush2.bf16.msra.mxu1 %v2940_v35 }
 0x20d   :  { %2187 = vmatprep.subr.bf16.mxu0 %v2941_v41  ;;  %2228 = vmatprep.subr.bf16.mxu1 %v2942_v47 }
 0x210   :  { %2188 = vmatpush2.bf16.msra.mxu0 %v2943_v48  ;;  %2229 = vmatpush2.bf16.msra.mxu1 %v2944_v50 }
 0x213   :  { %2190 = vmatmul.mubr.bf16.vlgmr.msra.gmra.mxu0 %v3425_v30  ;;  %2231 = vmatmul.mubr.bf16.vlgmr.msra.gmra.mxu1 %v3425_v30 }
 0x293   :  { %v2109_v26 = vpop.f32.mrf.mxu0  ;;  %v2150_v44 = vpop.f32.mrf.mxu1 }
 0x294   :  { %v2110_v49 = vadd.f32 %v2109_v26, %v3281_v5  ;;  %v2151_v7 = vadd.f32 %v2150_v44, %v3375_v56 }
 0x295   :  { %v2111_v9 = vpop.f32.mrf.mxu0  ;;  %v2152_v54 = vpop.f32.mrf.mxu1 }
 0x296   :  { %v2112_v46 = vadd.f32 %v2111_v9, %v3284_v6  ;;  %v2507_v53 = vmul.f32 -1.442695, %v2110_v49  ;;  %v2153_v30 = vadd.f32 %v2152_v54, %v3377_v55  ;;  %v2509_v63 = vmul.f32 -1.442695, %v2151_v7 }
 0x297   :  { %v2113_v38 = vpop.f32.mrf.mxu0  ;;  %v2154_v43 = vpop.f32.mrf.mxu1 }
 0x298   :  { %v2508_v4 = vmul.f32 -1.442695, %v2112_v46  ;;  %2763 = vpow2.f32 %v2507_v53  ;;  %v2510_v12 = vmul.f32 -1.442695, %v2153_v30 }
 0x299   :  { %v2114_v45 = vpop.f32.mrf.mxu0  ;;  %v2155_v40 = vpop.f32.mrf.mxu1 }
 0x29a   :  { %2765 = vpow2.f32 %v2508_v4 }
 0x29b   :  { %2767 = vpow2.f32 %v2509_v63 }
 0x2a5   :  { %v2764_v10 = vpop.eup %2763 }
 0x2a6   :  { %v2245_v11 = vadd.f32 1.0, %v2764_v10 }
 0x2a7   :  { %v2766_v8 = vpop.eup %2765 }
 0x2a8   :  { %v2246_v3 = vadd.f32 1.0, %v2766_v8  ;;  %2769 = vrcp.f32 %v2245_v11  ;;  %v2768_v33 = vpop.eup %2767 }
 0x2a9   :  { %2771 = vpow2.f32 %v2510_v12  ;;  %v2257_v60 = vadd.f32 1.0, %v2768_v33 }
 0x2aa   :  { %2773 = vrcp.f32 %v2246_v3 }
 0x2b5   :  { %v2770_v34 = vpop.eup %2769 }
 0x2b6   :  { %v2772_v61 = vpop.eup %2771 }
 0x2b7   :  { %v2774_v0 = vpop.eup %2773 }
 0x2d3   :  { %v2191_v5 = vpop.f32.mrf.mxu0  ;;  %v2232_v6 = vpop.f32.mrf.mxu1 }
 0x2d4   :  { %v2233_v27 = vadd.f32 %v2232_v6, %v3395_v13  ;;  %v2192_v55 = vadd.f32 %v2191_v5, %v3392_v42  ;;  %v2258_v13 = vadd.f32 1.0, %v2772_v61 }
 0x2d5   :  { %v2193_v36 = vpop.f32.mrf.mxu0  ;;  %v2234_v56 = vpop.f32.mrf.mxu1 }
 0x2d6   :  { %v2263_v62 = vmul.f32 %v2770_v34, %v2233_v27  ;;  %v2235_v57 = vadd.f32 %v2234_v56, %v3398_v32  ;;  %v2194_v25 = vadd.f32 %v2193_v36, %v3403_v39 }
 0x2d7   :  { %v2195_v37 = vpop.f32.mrf.mxu0  ;;  %v2236_v1 = vpop.f32.mrf.mxu1 }
 0x2d8   :  { %v2265_v2 = vadd.f32 %v2263_v62, %v2192_v55  ;;  %v2264_v59 = vmul.f32 %v2774_v0, %v2235_v57 }
 0x2d9   :  { %v2196_v14 = vpop.f32.mrf.mxu0  ;;  %v2237_v28 = vpop.f32.mrf.mxu1 }
 0x2da   :  { %2775 = vtanh.f32 %v2265_v2  ;;  %v2266_v15 = vadd.f32 %v2264_v59, %v2194_v25 }
 0x2db   :  { %2777 = vrcp.f32 %v2257_v60 }
 0x2dc   :  { %2779 = vtanh.f32 %v2266_v15 }
 0x2dd   :  { %2781 = vrcp.f32 %v2258_v13 }
 0x2e7   :  { %v2776_v42 = vpop.eup %2775 }
 0x2e8   :  { %v2778_v19 = vpop.eup %2777  ;;  %v2269_v32 = vsub.f32 %v3419_v23, %v2776_v42 }
 0x2e9   :  { %v2780_v29 = vpop.eup %2779 }
 0x2ea   :  { %v2271_v51 = vmul.f32 %v2778_v19, %v2269_v32  ;;  %v2270_v21 = vsub.f32 %v3417_v22, %v2780_v29  ;;  %v2782_v52 = vpop.eup %2781 }
 0x2ec   :  { %v2272_v16 = vmul.f32 %v2782_v52, %v2270_v21  ;;  %v2273_v39 = vadd.f32 %v2776_v42, %v2271_v51 }
 0x2ee   :  { %v2274_v18 = vadd.f32 %v2780_v29, %v2272_v16 }
 0x2f0   :  { %v2277_v20 = vcombine.low %v2273_v39, %v2274_v18 }
 0x2f2   :  { %v2284_v24 = vrot.slane %v2277_v20, %v3408_v58 }
 0x2f4   :  { %v2291_v31 = vrot.slane %v2284_v24, %v3408_v58 }
 0x2f6   :  { %2297 = vst.msk [vmem:[%s3456_s9] sm:$0x3] %vm2295_vm0, %v2291_v31 }
 0x2f7   :  { %2302 = vsyncpa [#allocation5], 1 }
 0x2f8   :  { %2303 = vsyncpa [#allocation7], 1 }

</bundles_post_ra>
